<compile_context>
chip_gen: v6e
topology: v6e:2x2x1
jax: 0.10.0
libtpu: 0.0.40
codegen_flags: <defaults>
</compile_context>

<pallas_src>
import math

import jax
import jax.numpy as jnp
from jax.experimental import pallas as pl
from jax.experimental.pallas import tpu as pltpu

NUM_HEADS = 8  # the module hard-codes 8 heads


def _mha_residual_kernel(x_ref, wqkv_ref, bqkv_ref, wo_ref, bo_ref,
                         out_ref, w_ref):
    """One grid step = one batch element; heads batched along the leading axis.

    x_ref    : (1, L, E)   f32
    wqkv_ref : (3H, E, D)  bf16 resident  ([0:H)=q heads, [H:2H)=k, [2H:3H)=v)
    bqkv_ref : (3H, 1, D)  f32  resident
    wo_ref   : (H, D, E)   bf16 resident
    bo_ref   : (1, E)      f32  resident
    out_ref  : (1, L, E)   f32  -> x + attn_out   (aliases x)
    w_ref    : (1, L, L)   f32  -> head-averaged attention probabilities
    """
    H, D, E = wo_ref.shape
    x = x_ref[0]                                    # (L, E) f32
    L = x.shape[0]
    scale = 1.0 / math.sqrt(D)

    # Batched per-head QKV projection: (3H, L, E) @ (3H, E, D) -> (3H, L, D).
    xg = jnp.broadcast_to(x.astype(jnp.bfloat16)[None], (3 * H, L, E))
    qkv = jnp.einsum('gle,ged->gld', xg, wqkv_ref[...],
                     preferred_element_type=jnp.float32) + bqkv_ref[...]

    # Head/QKV split along the leading (major) dim -- free, no lane shuffles.
    q = (qkv[:H] * scale).astype(jnp.bfloat16)      # (H, L, D)
    k = qkv[H:2 * H].astype(jnp.bfloat16)           # (H, L, D)
    v = qkv[2 * H:].astype(jnp.bfloat16)            # (H, L, D)

    # One batched score matmul + one batched (exact, f32) softmax over heads.
    s = jnp.einsum('hqd,hkd->hqk', q, k,
                   preferred_element_type=jnp.float32)          # (H, L, L)
    s = s - jnp.max(s, axis=-1, keepdims=True)
    e = jnp.exp(s)
    p = e / jnp.sum(e, axis=-1, keepdims=True)                  # (H, L, L) f32

    # Batched P @ V and batched out-projection, head-summed into one accumulator.
    o = jnp.einsum('hqk,hkd->hqd', p.astype(jnp.bfloat16), v,
                   preferred_element_type=jnp.float32)          # (H, L, D)
    attn_h = jnp.einsum('hld,hde->hle', o.astype(jnp.bfloat16), wo_ref[...],
                        preferred_element_type=jnp.float32)     # (H, L, E)
    attn = jnp.sum(attn_h, axis=0) + bo_ref[...]                # (L, E) f32

    # Single store per output block: residual add + static head average.
    out_ref[0, :, :] = x + attn
    w_ref[0, :, :] = jnp.sum(p, axis=0) * (1.0 / H)


def _pack_params(in_proj_weight, in_proj_bias, out_proj_weight, out_proj_bias,
                 num_heads):
    """Repack nn.MultiheadAttention params into head-batched operands (XLA-side)."""
    three_e, E = in_proj_weight.shape
    H = num_heads
    D = E // H
    # qkv = x @ in_proj_weight.T + in_proj_bias; head h = features [h*D:(h+1)*D].
    w_qkv = (in_proj_weight.reshape(3, H, D, E)
             .transpose(0, 1, 3, 2)
             .reshape(3 * H, E, D)
             .astype(jnp.bfloat16))
    b_qkv = in_proj_bias.reshape(3 * H, 1, D).astype(jnp.float32)
    # out = concat_heads @ out_proj_weight.T + out_proj_bias.
    w_out = out_proj_weight.T.reshape(H, D, E).astype(jnp.bfloat16)
    b_out = out_proj_bias.reshape(1, E).astype(jnp.float32)
    return w_qkv, b_qkv, w_out, b_out


@jax.jit
def residual_add_attention(x, in_proj_weight, in_proj_bias,
                           out_proj_weight, out_proj_bias):
    """x: (B, L, E) f32; params in nn.MultiheadAttention layout
    (in_proj_weight (3E,E), in_proj_bias (3E,), out_proj.weight (E,E), bias (E,)).
    Returns (x + attn_out, avg_attn_weights): (B, L, E), (B, L, L)."""
    B, L, E = x.shape
    H = NUM_HEADS
    D = E // H
    w_qkv, b_qkv, w_out, b_out = _pack_params(
        in_proj_weight, in_proj_bias, out_proj_weight, out_proj_bias, H)

    out_shapes = (jax.ShapeDtypeStruct((B, L, E), jnp.float32),
                  jax.ShapeDtypeStruct((B, L, L), jnp.float32))

    return pl.pallas_call(
        _mha_residual_kernel,
        out_shape=out_shapes,
        grid=(B,),
        in_specs=(
            pl.BlockSpec((1, L, E), lambda b: (b, 0, 0)),       # x: per-batch tile
            pl.BlockSpec((3 * H, E, D), lambda b: (0, 0, 0)),   # weights resident
            pl.BlockSpec((3 * H, 1, D), lambda b: (0, 0, 0)),
            pl.BlockSpec((H, D, E), lambda b: (0, 0, 0)),
            pl.BlockSpec((1, E), lambda b: (0, 0)),
        ),
        out_specs=(
            pl.BlockSpec((1, L, E), lambda b: (b, 0, 0)),
            pl.BlockSpec((1, L, L), lambda b: (b, 0, 0)),
        ),
        input_output_aliases={0: 0},                            # x += res in place
        compiler_params=pltpu.CompilerParams(
            dimension_semantics=("parallel",),
            vmem_limit_bytes=32 * 1024 * 1024),
    )(x, w_qkv, b_qkv, w_out, b_out)


def _reference(x, in_proj_weight, in_proj_bias, out_proj_weight, out_proj_bias,
               num_heads=NUM_HEADS, op_dtype=jnp.float32):
    """Pure-JAX reference mirroring nn.MultiheadAttention (eval, avg weights).
    op_dtype=jnp.bfloat16 mirrors the kernel's bf16 MXU operands (f32 accum)."""
    B, L, E = x.shape
    H = num_heads
    D = E // H
    scale = 1.0 / math.sqrt(D)
    f32 = jnp.float32

    qkv = jnp.einsum('ble,fe->blf', x.astype(op_dtype),
                     in_proj_weight.astype(op_dtype),
                     preferred_element_type=f32) + in_proj_bias
    q, k, v = qkv[..., :E], qkv[..., E:2 * E], qkv[..., 2 * E:]

    def heads(t):
        return t.reshape(B, L, H, D).transpose(0, 2, 1, 3)

    q, k, v = heads(q) * scale, heads(k), heads(v)
    s = jnp.einsum('bhqd,bhkd->bhqk', q.astype(op_dtype), k.astype(op_dtype),
                   preferred_element_type=f32)
    p = jax.nn.softmax(s, axis=-1)
    o = jnp.einsum('bhqk,bhkd->bhqd', p.astype(op_dtype), v.astype(op_dtype),
                   preferred_element_type=f32)
    o = o.transpose(0, 2, 1, 3).reshape(B, L, E)
    res = jnp.einsum('ble,fe->blf', o.astype(op_dtype),
                     out_proj_weight.astype(op_dtype),
                     preferred_element_type=f32) + out_proj_bias
    return x + res, jnp.mean(p, axis=1)


if __name__ == "__main__":
    B, L = 2, 8
    hidden_size = 32

    key = jax.random.PRNGKey(0)
    kx, kin, kbi, kwo, kbo = jax.random.split(key, 5)

    x = jax.random.normal(kx, (B, L, hidden_size), dtype=jnp.float32)
    # nn.MultiheadAttention parameters (deterministic synthetic init):
    in_proj_weight = 0.1 * jax.random.normal(
        kin, (3 * hidden_size, hidden_size), dtype=jnp.float32)
    in_proj_bias = 0.05 * jax.random.normal(
        kbi, (3 * hidden_size,), dtype=jnp.float32)
    out_proj_weight = 0.1 * jax.random.normal(
        kwo, (hidden_size, hidden_size), dtype=jnp.float32)
    out_proj_bias = 0.05 * jax.random.normal(
        kbo, (hidden_size,), dtype=jnp.float32)

    # References computed before the kernel call (the kernel aliases x).
    ref_out_f32, ref_w_f32 = _reference(x, in_proj_weight, in_proj_bias,
                                        out_proj_weight, out_proj_bias,
                                        op_dtype=jnp.float32)
    ref_out_bf16, ref_w_bf16 = _reference(x, in_proj_weight, in_proj_bias,
                                          out_proj_weight, out_proj_bias,
                                          op_dtype=jnp.bfloat16)

    out, w = residual_add_attention(x, in_proj_weight, in_proj_bias,
                                    out_proj_weight, out_proj_bias)
    out = jax.block_until_ready(out)
    w = jax.block_until_ready(w)

    assert out.shape == (B, L, hidden_size) and w.shape == (B, L, L)
    # Tight check against a reference that mirrors the kernel's bf16 MXU operands.
    assert jnp.allclose(out, ref_out_bf16, atol=5e-3, rtol=5e-3), "output mismatch (bf16 ref)"
    assert jnp.allclose(w, ref_w_bf16, atol=5e-3, rtol=5e-3), "attn weights mismatch (bf16 ref)"
    # Loose check against the exact-f32 PyTorch-equivalent reference
    # (slack covers the bf16 matmul operands).
    assert jnp.allclose(out, ref_out_f32, atol=3e-2, rtol=3e-2), "output mismatch (f32 ref)"
    assert jnp.allclose(w, ref_w_f32, atol=3e-2, rtol=3e-2), "attn weights mismatch (f32 ref)"

    print("KERNEL_OK")
</pallas_src>

<mosaic_0001>
module attributes {stable_mosaic.version = 11 : i64} {
  func.func @_mha_residual_kernel(%arg0: i32, %arg1: memref<1x8x32xf32, #tpu.memory_space<vmem>>, %arg2: memref<24x32x4xbf16, #tpu.memory_space<vmem>>, %arg3: memref<24x1x4xf32, #tpu.memory_space<vmem>>, %arg4: memref<8x4x32xbf16, #tpu.memory_space<vmem>>, %arg5: memref<1x32xf32, #tpu.memory_space<vmem>>, %arg6: memref<1x8x32xf32, #tpu.memory_space<vmem>>, %arg7: memref<1x8x8xf32, #tpu.memory_space<vmem>>) attributes {dimension_semantics = [#tpu.dimension_semantics<parallel>], iteration_bounds = array<i64: 2>, scalar_prefetch = 0 : i64, scratch_operands = 0 : i64, tpu.core_type = #tpu.core_type<tc>, window_params = [{transform_indices = @transform_0, window_bounds = array<i64: 1, 8, 32>}, {pipeline_mode = #tpu.pipeline_mode<synchronous>, transform_indices = @transform_1, window_bounds = array<i64: 24, 32, 4>}, {pipeline_mode = #tpu.pipeline_mode<synchronous>, transform_indices = @transform_2, window_bounds = array<i64: 24, 1, 4>}, {pipeline_mode = #tpu.pipeline_mode<synchronous>, transform_indices = @transform_3, window_bounds = array<i64: 8, 4, 32>}, {pipeline_mode = #tpu.pipeline_mode<synchronous>, transform_indices = @transform_4, window_bounds = array<i64: 1, 32>}, {transform_indices = @transform_5, window_bounds = array<i64: 1, 8, 32>}, {transform_indices = @transform_6, window_bounds = array<i64: 1, 8, 8>}]} {
    %c0 = arith.constant 0 : index
    %c0_0 = arith.constant 0 : index
    %c0_1 = arith.constant 0 : index
    %0 = vector.load %arg1[%c0, %c0_0, %c0_1] : memref<1x8x32xf32, #tpu.memory_space<vmem>>, vector<1x8x32xf32>
    %1 = vector.shape_cast %0 : vector<1x8x32xf32> to vector<8x32xf32>
    %2 = arith.truncf %1 : vector<8x32xf32> to vector<8x32xbf16>
    %3 = vector.shape_cast %2 : vector<8x32xbf16> to vector<1x8x32xbf16>
    %4 = vector.shape_cast %3 : vector<1x8x32xbf16> to vector<1x8x32xbf16>
    %5 = vector.broadcast %4 : vector<1x8x32xbf16> to vector<24x8x32xbf16>
    %c0_2 = arith.constant 0 : index
    %c0_3 = arith.constant 0 : index
    %c0_4 = arith.constant 0 : index
    %6 = vector.load %arg2[%c0_2, %c0_3, %c0_4] : memref<24x32x4xbf16, #tpu.memory_space<vmem>>, vector<24x32x4xbf16>
    "tpu.trace_start"() <{level = 10 : i32, message = "gle,ged->gld"}> : () -> ()
    %cst = arith.constant dense<0.000000e+00> : vector<24x8x4xf32>
    %7 = tpu.matmul %5, %6, %cst {dimension_numbers = #tpu.dot_dimension_numbers<[2], [1], [1], [2], [0, 0, 0, 1, 1, 2], [0], [0]>} : vector<24x8x32xbf16>, vector<24x32x4xbf16>, vector<24x8x4xf32> -> vector<24x8x4xf32>
    "tpu.trace_stop"() : () -> ()
    %c0_5 = arith.constant 0 : index
    %c0_6 = arith.constant 0 : index
    %c0_7 = arith.constant 0 : index
    %8 = vector.load %arg3[%c0_5, %c0_6, %c0_7] : memref<24x1x4xf32, #tpu.memory_space<vmem>>, vector<24x1x4xf32>
    %9 = vector.broadcast %8 : vector<24x1x4xf32> to vector<24x8x4xf32>
    %10 = arith.addf %7, %9 : vector<24x8x4xf32>
    %11 = vector.extract_strided_slice %10 {offsets = [0, 0, 0], sizes = [8, 8, 4], strides = [1, 1, 1]} : vector<24x8x4xf32> to vector<8x8x4xf32>
    %cst_8 = arith.constant 5.000000e-01 : f32
    %12 = vector.broadcast %cst_8 : f32 to vector<8x8x4xf32>
    %13 = arith.mulf %11, %12 : vector<8x8x4xf32>
    %14 = arith.truncf %13 : vector<8x8x4xf32> to vector<8x8x4xbf16>
    %15 = vector.extract_strided_slice %10 {offsets = [8, 0, 0], sizes = [8, 8, 4], strides = [1, 1, 1]} : vector<24x8x4xf32> to vector<8x8x4xf32>
    %16 = arith.truncf %15 : vector<8x8x4xf32> to vector<8x8x4xbf16>
    %17 = vector.extract_strided_slice %10 {offsets = [16, 0, 0], sizes = [8, 8, 4], strides = [1, 1, 1]} : vector<24x8x4xf32> to vector<8x8x4xf32>
    %18 = arith.truncf %17 : vector<8x8x4xf32> to vector<8x8x4xbf16>
    "tpu.trace_start"() <{level = 10 : i32, message = "hqd,hkd->hqk"}> : () -> ()
    %cst_9 = arith.constant dense<0.000000e+00> : vector<8x8x8xf32>
    %19 = tpu.matmul %14, %16, %cst_9 {dimension_numbers = #tpu.dot_dimension_numbers<[2], [2], [1], [1], [0, 0, 0, 1, 1, 1], [0], [0]>} : vector<8x8x4xbf16>, vector<8x8x4xbf16>, vector<8x8x8xf32> -> vector<8x8x8xf32>
    "tpu.trace_stop"() : () -> ()
    %cst_10 = arith.constant dense<0xFF800000> : vector<8x8xf32>
    %20 = vector.multi_reduction <maximumf>, %19, %cst_10 [2] : vector<8x8x8xf32> to vector<8x8xf32>
    %21 = vector.shape_cast %20 : vector<8x8xf32> to vector<8x8x1xf32>
    %22 = vector.broadcast %21 : vector<8x8x1xf32> to vector<8x8x8xf32>
    %23 = arith.subf %19, %22 : vector<8x8x8xf32>
    %24 = math.exp %23 : vector<8x8x8xf32>
    %cst_11 = arith.constant dense<0.000000e+00> : vector<8x8xf32>
    %25 = vector.multi_reduction <add>, %24, %cst_11 [2] : vector<8x8x8xf32> to vector<8x8xf32>
    %26 = vector.shape_cast %25 : vector<8x8xf32> to vector<8x8x1xf32>
    %27 = vector.broadcast %26 : vector<8x8x1xf32> to vector<8x8x8xf32>
    %28 = arith.divf %24, %27 : vector<8x8x8xf32>
    %29 = arith.truncf %28 : vector<8x8x8xf32> to vector<8x8x8xbf16>
    "tpu.trace_start"() <{level = 10 : i32, message = "hqk,hkd->hqd"}> : () -> ()
    %cst_12 = arith.constant dense<0.000000e+00> : vector<8x8x4xf32>
    %30 = tpu.matmul %29, %18, %cst_12 {dimension_numbers = #tpu.dot_dimension_numbers<[2], [1], [1], [2], [0, 0, 0, 1, 1, 2], [0], [0]>} : vector<8x8x8xbf16>, vector<8x8x4xbf16>, vector<8x8x4xf32> -> vector<8x8x4xf32>
    "tpu.trace_stop"() : () -> ()
    %31 = arith.truncf %30 : vector<8x8x4xf32> to vector<8x8x4xbf16>
    %c0_13 = arith.constant 0 : index
    %c0_14 = arith.constant 0 : index
    %c0_15 = arith.constant 0 : index
    %32 = vector.load %arg4[%c0_13, %c0_14, %c0_15] : memref<8x4x32xbf16, #tpu.memory_space<vmem>>, vector<8x4x32xbf16>
    "tpu.trace_start"() <{level = 10 : i32, message = "hld,hde->hle"}> : () -> ()
    %cst_16 = arith.constant dense<0.000000e+00> : vector<8x8x32xf32>
    %33 = tpu.matmul %31, %32, %cst_16 {dimension_numbers = #tpu.dot_dimension_numbers<[2], [1], [1], [2], [0, 0, 0, 1, 1, 2], [0], [0]>} : vector<8x8x4xbf16>, vector<8x4x32xbf16>, vector<8x8x32xf32> -> vector<8x8x32xf32>
    "tpu.trace_stop"() : () -> ()
    %cst_17 = arith.constant dense<0.000000e+00> : vector<8x32xf32>
    %34 = vector.multi_reduction <add>, %33, %cst_17 [0] : vector<8x8x32xf32> to vector<8x32xf32>
    %c0_18 = arith.constant 0 : index
    %c0_19 = arith.constant 0 : index
    %35 = vector.load %arg5[%c0_18, %c0_19] : memref<1x32xf32, #tpu.memory_space<vmem>>, vector<1x32xf32>
    %36 = vector.broadcast %35 : vector<1x32xf32> to vector<8x32xf32>
    %37 = arith.addf %34, %36 : vector<8x32xf32>
    %38 = arith.addf %1, %37 : vector<8x32xf32>
    %c0_20 = arith.constant 0 : index
    %c0_21 = arith.constant 0 : index
    %c0_22 = arith.constant 0 : index
    %39 = vector.load %arg6[%c0_20, %c0_21, %c0_22] : memref<1x8x32xf32, #tpu.memory_space<vmem>>, vector<1x8x32xf32>
    %40 = vector.shape_cast %39 : vector<1x8x32xf32> to vector<8x32xf32>
    %41 = vector.shape_cast %38 : vector<8x32xf32> to vector<1x8x32xf32>
    tpu.vector_store %arg6[%c0_20, %c0_21, %c0_22], %41 {strides = array<i32>} : memref<1x8x32xf32, #tpu.memory_space<vmem>>, vector<1x8x32xf32>,
    %cst_23 = arith.constant dense<0.000000e+00> : vector<8x8xf32>
    %42 = vector.multi_reduction <add>, %28, %cst_23 [0] : vector<8x8x8xf32> to vector<8x8xf32>
    %cst_24 = arith.constant 1.250000e-01 : f32
    %43 = vector.broadcast %cst_24 : f32 to vector<8x8xf32>
    %44 = arith.mulf %42, %43 : vector<8x8xf32>
    %c0_25 = arith.constant 0 : index
    %c0_26 = arith.constant 0 : index
    %c0_27 = arith.constant 0 : index
    %45 = vector.load %arg7[%c0_25, %c0_26, %c0_27] : memref<1x8x8xf32, #tpu.memory_space<vmem>>, vector<1x8x8xf32>
    %46 = vector.shape_cast %45 : vector<1x8x8xf32> to vector<8x8xf32>
    %47 = vector.shape_cast %44 : vector<8x8xf32> to vector<1x8x8xf32>
    tpu.vector_store %arg7[%c0_25, %c0_26, %c0_27], %47 {strides = array<i32>} : memref<1x8x8xf32, #tpu.memory_space<vmem>>, vector<1x8x8xf32>,
    return
  }
  func.func @transform_0(%arg0: i32) -> (i32, i32, i32) {
    %c0_i32 = arith.constant 0 : i32
    %c0_i32_0 = arith.constant 0 : i32
    %c0_i32_1 = arith.constant 0 : i32
    return %arg0, %c0_i32, %c0_i32_0 : i32, i32, i32
  }
  func.func @transform_1(%arg0: i32) -> (i32, i32, i32) {
    %c0_i32 = arith.constant 0 : i32
    %c0_i32_0 = arith.constant 0 : i32
    %c0_i32_1 = arith.constant 0 : i32
    %c0_i32_2 = arith.constant 0 : i32
    return %c0_i32, %c0_i32_0, %c0_i32_1 : i32, i32, i32
  }
  func.func @transform_2(%arg0: i32) -> (i32, i32, i32) {
    %c0_i32 = arith.constant 0 : i32
    %c0_i32_0 = arith.constant 0 : i32
    %c0_i32_1 = arith.constant 0 : i32
    %c0_i32_2 = arith.constant 0 : i32
    return %c0_i32, %c0_i32_0, %c0_i32_1 : i32, i32, i32
  }
  func.func @transform_3(%arg0: i32) -> (i32, i32, i32) {
    %c0_i32 = arith.constant 0 : i32
    %c0_i32_0 = arith.constant 0 : i32
    %c0_i32_1 = arith.constant 0 : i32
    %c0_i32_2 = arith.constant 0 : i32
    return %c0_i32, %c0_i32_0, %c0_i32_1 : i32, i32, i32
  }
  func.func @transform_4(%arg0: i32) -> (i32, i32) {
    %c0_i32 = arith.constant 0 : i32
    %c0_i32_0 = arith.constant 0 : i32
    %c0_i32_1 = arith.constant 0 : i32
    return %c0_i32, %c0_i32_0 : i32, i32
  }
  func.func @transform_5(%arg0: i32) -> (i32, i32, i32) {
    %c0_i32 = arith.constant 0 : i32
    %c0_i32_0 = arith.constant 0 : i32
    %c0_i32_1 = arith.constant 0 : i32
    return %arg0, %c0_i32, %c0_i32_0 : i32, i32, i32
  }
  func.func @transform_6(%arg0: i32) -> (i32, i32, i32) {
    %c0_i32 = arith.constant 0 : i32
    %c0_i32_0 = arith.constant 0 : i32
    %c0_i32_1 = arith.constant 0 : i32
    return %arg0, %c0_i32, %c0_i32_0 : i32, i32, i32
  }
}

</mosaic_0001>

<bundles_post_ra>
// kernel: residual_add_attention.1
= control target key start
LH: loop header
LB: loop body
LE: loop exit
PB: predicated region body
PF: predicated region fallthrough
CT: control target
= control target key end

     0   :  { %12 = vsyncpa [#allocation3], 0  ;;  %s4877_s0 = inlined_call_operand.hbm [shape: f32[2,8,32], index: 0, kind: input, shape index: {}, may-alias: {0,5}]   ;;  %s4878_s1 = inlined_call_operand.vmem [shape: bf16[24,32,4], index: 1, kind: input, shape index: {}]   ;;  %s4879_s2 = inlined_call_operand.vmem [shape: f32[24,1,4], index: 2, kind: input, shape index: {}]   ;;  %s4880_s3 = inlined_call_operand.vmem [shape: bf16[8,4,32], index: 3, kind: input, shape index: {}]   ;;  %s4881_s4 = inlined_call_operand.vmem [shape: f32[1,32], index: 4, kind: input, shape index: {}]   ;;  %s4882_s5 = inlined_call_operand.hbm [shape: f32[2,8,32], index: 5, kind: output, shape index: {0}, may-alias: {0,5}]   ;;  %s4883_s6 = inlined_call_operand.hbm [shape: f32[2,8,8], index: 6, kind: output, shape index: {1}]  }
   0x1   :  { %14 = vsyncpa [#allocation3 + $0x1], 0 }
   0x2   :  { %15 = vsyncpa [#allocation4], 0 }
   0x3   :  { %17 = vsyncpa [#allocation4 + $0x1], 0 }
   0x4   :  { %18 = vsyncpa [#allocation7], 0 }
   0x5   :  { %20 = vsyncpa [#allocation7 + $0x1], 0  ;;  %s4115_s21 = smov 0   ;;  %s4117_s22 = smov 0  }
   0x6   :  { %s4119_s23 = smov 0   ;;  %s4121_s24 = smov 0  }
   0x7 LB: > { %s4136_s25 = sadd.s32 4294967295, %s4073_s24   ;;  %s3225_s26 = sadd.s32 4294967294, %s4073_s24   ;;  %s4073_s24 = sphi %s4121_s24, %s4904_s24   ;;  %s4069_s23 = sphi %s4119_s23, %s4903_s23   ;;  %s4065_s22 = sphi %s4117_s22, %s4902_s22   ;;  %s4061_s21 = sphi %s4115_s21, %s4901_s21  }
   0x8   : > { %s4140_s27 = sadd.s32 1, %s4073_s24   ;;  %s33_s28 = sadd.s32 1, %s4069_s23 }
   0x9   : > { %s30_s29 = ssub.s32 %s4073_s24, %s4140_s27  ;;  %p40_p0 = scmp.ne.s32.totalorder %s4069_s23, %s4065_s22 }
   0xa   : > { %p31_p1 = scmp.eq.s32.totalorder %s30_s29, 0  ;;  %p41_p2 = scmp.eq.s32.totalorder %s4073_s24, 0 }
   0xb   : > { %p46_p3 = scmp.ne.s32.totalorder %s4065_s22, %s4061_s21  ;;  %p47_p4 = scmp.eq.s32.totalorder %s4136_s25, 0 }
   0xc   : > { %s4152_s30 = scalar_select %p31_p1, %s4069_s23, %s33_s28  }
   0xd   : > { %p4154_p5 = por %p41_p2, %p40_p0  ;;  %p4158_p6 = por %p47_p4, %p46_p3 }
   0xe   : > { %p154_p7 = scmp.eq.s32.totalorder %s4136_s25, 1  ;;  %p160_p8 = scmp.eq.s32.totalorder %s3225_s26, 1 }
   0xf   : > { %s4889_s8 = scalar_select %p4158_p6, 1, 0 }
  0x10   : > { %p3834_p10 = scmp.lt.s32.totalorder %s4073_s24, 2  ;;  %p4165_p11 = por %p154_p7, %p40_p0 }
  0x11   : > { %p4169_p12 = por %p160_p8, %p46_p3  ;;  %s218_s11 = sand.u32 1, %s4069_s23  }
  0x12   : > { %s4890_s9 = scalar_select %p4165_p11, 1, 0 }
  0x13   : > { %s4891_s10 = scalar_select %p4169_p12, 1, 0 }
  0x14   : > { %s3229_s12 = sshll.u32 %s4073_s24, 7  ;;  %s3228_s13 = sshll.u32 %s218_s11, 3 }
  0x15   : > { %s4178_s16 = scalar_lea.hbm %s4877_s0, %s3229_s12  ;;  %s222_s17 = scalar_lea.vmem [#allocation2], %s3228_s13 }
  0x16   : > { %s229_s18 = sshll.u32 %s222_s17, 4  ;;  %p4182_p13 = pnand %p3834_p10, %p4154_p5  ;;  %s4186_s18 = int_to_ptr.vmem [resolvable:$true] %s229_s18 }
  0x17   : > { %s219_s20 = scalar_lea.sflag [#allocation3], %s218_s11  ;;  %s3951_s26 = scalar_lea.hbm %s4178_s16, 128 }
  0x18   : > { %p3952_p2 = scmp.ne.s32.totalorder %s4178_s16, %s3951_s26  ;;  %p3953_p3 = pneg %p4182_p13 }
  0x19   : > { %s3956_s7 = scalar_lea.hbm %s4877_s0, 256  ;;  %p3957_p5 = scmp.lt.s32.totalorder %s4178_s16, %s4877_s0 }
  0x1a   : > { %p3954_p4 = pnand %p3953_p3, %p3952_p2  ;;  %p3958_p8 = scmp.lt.s32.totalorder %s3956_s7, %s3951_s26 }
  0x1c   : > { %p3955_p7 = pneg %p3954_p4  ;;  %p3959_p10 = por %p3958_p8, %p3957_p5 }
  0x1e   : > { %p3960_p9 = pnand %p3959_p10, %p3955_p7 }
  0x20   : > { %3963 = shalt.err (!%p3960_p9)
}
  0x21   : > { %s3964_s11 = scalar_lea.vmem %s4186_s18, 128  ;;  %s4075_s14 = smov [#allocation2]  }
  0x22   : > { %p3965_p0 = scmp.ne.s32.totalorder %s4186_s18, %s3964_s11  ;;  %s3969_s15 = sshll.u32 %s4075_s14, 4  ;;  %s3970_s15 = int_to_ptr.vmem [resolvable:$false] %s3969_s15 }
  0x23   : > { %s3971_s17 = scalar_lea.vmem %s3970_s15, 256  ;;  %p3972_p4 = scmp.lt.s32.totalorder %s4186_s18, %s3970_s15 }
  0x24   : > { %p3967_p1 = pnand %p3965_p0, %p3953_p3  ;;  %p3973_p12 = scmp.lt.s32.totalorder %s3971_s17, %s3964_s11 }
  0x26   : > { %p3968_p2 = pneg %p3967_p1  ;;  %p3974_p11 = por %p3973_p12, %p3972_p4 }
  0x28   : > { %p3975_p6 = pnand %p3974_p11, %p3968_p2 }
  0x2a   : > { %3978 = shalt.err (!%p3975_p6)
}
  0x2b   : > { %3826 = dma.hbm_to_vmem [thread:$0]  (!%p4182_p13), %s4178_s16, 128, %s4186_s18, %s219_s20  }
  0x2c   : > { %p4893_p9 = scmp.lt.s32.totalorder %s4073_s24, 3  ;;  %p4894_p7 = scmp.ge.s32.totalorder %s4073_s24, 1 }
  0x2e   : > { %p235_p0 = pnand %p4894_p7, %p4893_p9 }
  0x2f   : > { %s4213_s26 = sand.u32 (!%p235_p0), 1, %s4065_s22   ;;  %p4895_p6 = scmp.ne.s32.totalorder (!%p235_p0), %s4889_s8, 0 }
  0x30   : > { %238 = sbr.rel (%p235_p0) target bundleno = 1244 (0x4dc), region = 40  ;;  %s4216_s28 = sshll.u32 (!%p235_p0), %s4213_s26, 3 }
  0x31   : > { %s241_s29 = scalar_lea.sflag (!%p235_p0), [#allocation3], %s4213_s26  ;;  %s4887_s19 = scalar_lea.vmem (!%p235_p0), [#allocation2], %s4216_s28 }
  0x35   : > { %4048 = dma.done.wait (%p4895_p6), %s241_s29, 128  }
  0x36   : > { %4050 = vsyncadd (%p4895_p6), %s241_s29, 4294967168  ;;  %v4076_v0 = vmov 0.0   ;;  %vm4077_vm0 = vmmov 0   ;;  %v3870_v1 = vld [vmem:[%s4878_s1 + $0x8] sm:$0xff]   ;;  %v3871_v2 = vld [vmem:[%s4878_s1 + $0x18] sm:$0xff]   ;;  %vm557_vm1 = vcmask 261120  }
  0x37   : > { %3481 = vmatprep.subr.bf16.mxu0 %v4076_v0  ;;  %3489 = vmatprep.subr.bf16.mxu1 %v4076_v0  ;;  %v3872_v3 = vld [vmem:[%s4878_s1] sm:$0xff]   ;;  %v3873_v4 = vld [vmem:[%s4878_s1 + $0x10] sm:$0xff]   ;;  %v3874_v7 = vld [vmem:[%s4878_s1 + $0x28] sm:$0xff]   ;;  %vm1829_vm2 = vcmask 31744   ;;  %vm2298_vm3 = vcmask 1043456   ;;  %vm2198_vm4 = vcmask 64512  }
  0x38   : > { %3485 = vmatprep.mubr.msk.bf16.mxu0 %vm4077_vm0, %v4076_v0  ;;  %3493 = vmatprep.mubr.msk.bf16.mxu1 %vm4077_vm0, %v4076_v0  ;;  %v279_v5 = vld [vmem:[%s4887_s19] sm:$0xff]  ;;  %v3875_v8 = vld [vmem:[%s4878_s1 + $0x38] sm:$0xff]   ;;  %v3877_v10 = vld [vmem:[%s4878_s1 + $0x30] sm:$0xff]   ;;  %vm2683_vm5 = vcmask 1041408   ;;  %s277_s20 = scalar_lea.vmem [#allocation6], %s4216_s28  ;;  %s4886_s13 = sshll.u32 %s4136_s25, 7 }
  0x39   : > { %3482 = vmatpush3.bf16.msra.mxu0 %v3870_v1  ;;  %3490 = vmatpush3.bf16.msra.mxu1 %v3871_v2  ;;  %v4246_v6 = vpack.c.bf16 %v279_v5, %v279_v5  ;;  %v3876_v9 = vld [vmem:[%s4878_s1 + $0x20] sm:$0xff]   ;;  %v3878_v11 = vld [vmem:[%s4878_s1 + $0x48] sm:$0xff]   ;;  %v3879_v12 = vld [vmem:[%s4878_s1 + $0x58] sm:$0xff]   ;;  %s3121_s15 = scalar_lea.hbm %s4883_s6, %s4886_s13  ;;  %s3123_s17 = sshll.u32 %s277_s20, 4  ;;  %s3124_s17 = int_to_ptr.vmem [resolvable:$true] %s3123_s17 }
  0x3a   : > { %3483 = vmatprep.subr.bf16.mxu0 %v4076_v0  ;;  %3491 = vmatprep.subr.bf16.mxu1 %v4076_v0  ;;  %v3880_v13 = vld [vmem:[%s4878_s1 + $0x40] sm:$0xff]   ;;  %v3881_v14 = vld [vmem:[%s4878_s1 + $0x50] sm:$0xff]   ;;  %v3882_v15 = vld [vmem:[%s4878_s1 + $0x68] sm:$0xff]   ;;  %s3097_s29 = scalar_lea.sflag [#allocation7], %s4213_s26  ;;  %s3979_s16 = scalar_lea.vmem %s3124_s17, 128 }
  0x3b   : > { %v3883_v16 = vld [vmem:[%s4878_s1 + $0x78] sm:$0xff]   ;;  %v3884_v17 = vld [vmem:[%s4878_s1 + $0x60] sm:$0xff]   ;;  %v3885_v18 = vld [vmem:[%s4878_s1 + $0x70] sm:$0xff]   ;;  %p3980_p11 = scmp.ne.s32.totalorder %s3124_s17, %s3979_s16  ;;  %p4896_p12 = scmp.ne.s32.totalorder %s4890_s9, 0 }
  0x3c   : > { %v3886_v19 = vld [vmem:[%s4878_s1 + $0x88] sm:$0xff]   ;;  %v3887_v20 = vld [vmem:[%s4878_s1 + $0x98] sm:$0xff]   ;;  %v3888_v21 = vld [vmem:[%s4878_s1 + $0x80] sm:$0xff]   ;;  %s4078_s18 = smov [#allocation6]  }
  0x3d   : > { %3484 = vmatpush3.bf16.msra.mxu0 %v3872_v3  ;;  %3492 = vmatpush3.bf16.msra.mxu1 %v3873_v4  ;;  %v3889_v22 = vld [vmem:[%s4878_s1 + $0x90] sm:$0xff]   ;;  %v3890_v23 = vld [vmem:[%s4878_s1 + $0xa8] sm:$0xff]   ;;  %v3891_v24 = vld [vmem:[%s4878_s1 + $0xb8] sm:$0xff]   ;;  %p3981_p13 = pnand %p3980_p11, %p4896_p12  ;;  %s3983_s8 = sshll.u32 %s4078_s18, 4  ;;  %s3984_s8 = int_to_ptr.vmem [resolvable:$false] %s3983_s8 }
  0x3e   : > { %3497 = vmatprep.subr.bf16.mxu0 %v4076_v0  ;;  %3505 = vmatprep.subr.bf16.mxu1 %v4076_v0  ;;  %v3892_v25 = vld [vmem:[%s4878_s1 + $0xa0] sm:$0xff]   ;;  %v3893_v26 = vld [vmem:[%s4878_s1 + $0xb0] sm:$0xff]   ;;  %v3894_v27 = vld [vmem:[%s4878_s1 + $0xc8] sm:$0xff]   ;;  %s3985_s7 = scalar_lea.vmem %s3984_s8, 256  ;;  %p3986_p3 = scmp.lt.s32.totalorder %s3124_s17, %s3984_s8 }
  0x3f   : > { %v3895_v28 = vld [vmem:[%s4878_s1 + $0xd8] sm:$0xff]   ;;  %v3896_v29 = vld [vmem:[%s4878_s1 + $0xc0] sm:$0xff]   ;;  %v3897_v30 = vld [vmem:[%s4878_s1 + $0xd0] sm:$0xff]   ;;  %p3982_p1 = pneg %p3981_p13  ;;  %p3987_p5 = scmp.lt.s32.totalorder %s3985_s7, %s3979_s16 }
  0x40   : > { %3486 = vmatmul.mubr.msk.bf16.vlgmr.msra.gmra.mxu0 %vm557_vm1, %v4246_v6  ;;  %3494 = vmatmul.mubr.msk.bf16.vlgmr.msra.gmra.mxu1 %vm557_vm1, %v4246_v6  ;;  %v3898_v31 = vld [vmem:[%s4878_s1 + $0xe8] sm:$0xff]   ;;  %v3899_v32 = vld [vmem:[%s4878_s1 + $0xf8] sm:$0xff]   ;;  %v3900_v33 = vld [vmem:[%s4878_s1 + $0xe0] sm:$0xff]  }
  0x41   : > { %3498 = vmatpush3.bf16.msra.mxu0 %v3874_v7  ;;  %3506 = vmatpush3.bf16.msra.mxu1 %v3875_v8  ;;  %v3901_v34 = vld [vmem:[%s4878_s1 + $0xf0] sm:$0xff]   ;;  %v3902_v35 = vld [vmem:[%s4878_s1 + $0x108] sm:$0xff]   ;;  %v3903_v36 = vld [vmem:[%s4878_s1 + $0x100] sm:$0xff]   ;;  %p3988_p8 = por %p3987_p5, %p3986_p3 }
  0x42   : > { %3499 = vmatprep.subr.bf16.mxu0 %v4076_v0  ;;  %3507 = vmatprep.subr.bf16.mxu1 %v4076_v0  ;;  %v3904_v37 = vld [vmem:[%s4878_s1 + $0x118] sm:$0xff]   ;;  %v3905_v38 = vld [vmem:[%s4878_s1 + $0x110] sm:$0xff]   ;;  %v3906_v39 = vld [vmem:[%s4878_s1 + $0x128] sm:$0xff]  }
  0x43   : > { %3501 = vmatprep.mubr.msk.bf16.mxu0 %vm4077_vm0, %v4076_v0  ;;  %3509 = vmatprep.mubr.msk.bf16.mxu1 %vm4077_vm0, %v4076_v0  ;;  %v3907_v40 = vld [vmem:[%s4878_s1 + $0x120] sm:$0xff]   ;;  %v3908_v41 = vld [vmem:[%s4878_s1 + $0x138] sm:$0xff]   ;;  %v3909_v42 = vld [vmem:[%s4878_s1 + $0x130] sm:$0xff]   ;;  %p3989_p10 = pnand %p3988_p8, %p3982_p1 }
  0x44   : > { %v3910_v43 = vld [vmem:[%s4878_s1 + $0x148] sm:$0xff]   ;;  %v3911_v44 = vld [vmem:[%s4878_s1 + $0x140] sm:$0xff]   ;;  %v3912_v45 = vld [vmem:[%s4878_s1 + $0x158] sm:$0xff]  }
  0x45   : > { %3500 = vmatpush3.bf16.msra.mxu0 %v3876_v9  ;;  %3508 = vmatpush3.bf16.msra.mxu1 %v3877_v10  ;;  %v3913_v46 = vld [vmem:[%s4878_s1 + $0x150] sm:$0xff]   ;;  %v3914_v47 = vld [vmem:[%s4878_s1 + $0x168] sm:$0xff]   ;;  %v3915_v48 = vld [vmem:[%s4878_s1 + $0x160] sm:$0xff]  }
  0x46   : > { %3513 = vmatprep.subr.bf16.mxu0 %v4076_v0  ;;  %3521 = vmatprep.subr.bf16.mxu1 %v4076_v0  ;;  %v3916_v49 = vld [vmem:[%s4878_s1 + $0x178] sm:$0xff]   ;;  %v3917_v50 = vld [vmem:[%s4878_s1 + $0x170] sm:$0xff]  }
  0x48   : > { %3502 = vmatmul.mubr.msk.bf16.vlgmr.msra.gmra.mxu0 %vm557_vm1, %v4246_v6  ;;  %3510 = vmatmul.mubr.msk.bf16.vlgmr.msra.gmra.mxu1 %vm557_vm1, %v4246_v6 }
  0x49   : > { %3514 = vmatpush3.bf16.msra.mxu0 %v3878_v11  ;;  %3522 = vmatpush3.bf16.msra.mxu1 %v3879_v12 }
  0x4a   : > { %3515 = vmatprep.subr.bf16.mxu0 %v4076_v0  ;;  %3523 = vmatprep.subr.bf16.mxu1 %v4076_v0 }
  0x4b   : > { %3517 = vmatprep.mubr.msk.bf16.mxu0 %vm4077_vm0, %v4076_v0  ;;  %3525 = vmatprep.mubr.msk.bf16.mxu1 %vm4077_vm0, %v4076_v0 }
  0x4d   : > { %3516 = vmatpush3.bf16.msra.mxu0 %v3880_v13  ;;  %3524 = vmatpush3.bf16.msra.mxu1 %v3881_v14 }
  0x4e   : > { %3529 = vmatprep.subr.bf16.mxu0 %v4076_v0  ;;  %3537 = vmatprep.subr.bf16.mxu1 %v4076_v0 }
  0x50   : > { %3518 = vmatmul.mubr.msk.bf16.vlgmr.msra.gmra.mxu0 %vm557_vm1, %v4246_v6  ;;  %3526 = vmatmul.mubr.msk.bf16.vlgmr.msra.gmra.mxu1 %vm557_vm1, %v4246_v6 }
  0x51   : > { %3530 = vmatpush3.bf16.msra.mxu0 %v3882_v15  ;;  %3538 = vmatpush3.bf16.msra.mxu1 %v3883_v16 }
  0x52   : > { %3531 = vmatprep.subr.bf16.mxu0 %v4076_v0  ;;  %3539 = vmatprep.subr.bf16.mxu1 %v4076_v0 }
  0x53   : > { %3533 = vmatprep.mubr.msk.bf16.mxu0 %vm4077_vm0, %v4076_v0  ;;  %3541 = vmatprep.mubr.msk.bf16.mxu1 %vm4077_vm0, %v4076_v0 }
  0x55   : > { %3532 = vmatpush3.bf16.msra.mxu0 %v3884_v17  ;;  %3540 = vmatpush3.bf16.msra.mxu1 %v3885_v18 }
  0x56   : > { %3545 = vmatprep.subr.bf16.mxu0 %v4076_v0  ;;  %3553 = vmatprep.subr.bf16.mxu1 %v4076_v0 }
  0x58   : > { %3534 = vmatmul.mubr.msk.bf16.vlgmr.msra.gmra.mxu0 %vm557_vm1, %v4246_v6  ;;  %3542 = vmatmul.mubr.msk.bf16.vlgmr.msra.gmra.mxu1 %vm557_vm1, %v4246_v6 }
  0x59   : > { %3546 = vmatpush3.bf16.msra.mxu0 %v3886_v19  ;;  %3554 = vmatpush3.bf16.msra.mxu1 %v3887_v20  ;;  %v3242_v19 = vld [vmem:[%s4879_s2 + $0x8] ss:$0 sm:$0xff] }
  0x5a   : > { %3547 = vmatprep.subr.bf16.mxu0 %v4076_v0  ;;  %3555 = vmatprep.subr.bf16.mxu1 %v4076_v0 }
  0x5b   : > { %3549 = vmatprep.mubr.msk.bf16.mxu0 %vm4077_vm0, %v4076_v0  ;;  %3557 = vmatprep.mubr.msk.bf16.mxu1 %vm4077_vm0, %v4076_v0 }
  0x5d   : > { %3548 = vmatpush3.bf16.msra.mxu0 %v3888_v21  ;;  %3556 = vmatpush3.bf16.msra.mxu1 %v3889_v22  ;;  %v3243_v21 = vld [vmem:[%s4879_s2 + $0x9] ss:$0 sm:$0xff]  ;;  %v3234_v22 = vld [vmem:[%s4879_s2] ss:$0 sm:$0xff] }
  0x5e   : > { %3561 = vmatprep.subr.bf16.mxu0 %v4076_v0  ;;  %3569 = vmatprep.subr.bf16.mxu1 %v4076_v0 }
  0x60   : > { %3550 = vmatmul.mubr.msk.bf16.vlgmr.msra.gmra.mxu0 %vm557_vm1, %v4246_v6  ;;  %3558 = vmatmul.mubr.msk.bf16.vlgmr.msra.gmra.mxu1 %vm557_vm1, %v4246_v6 }
  0x61   : > { %3562 = vmatpush3.bf16.msra.mxu0 %v3890_v23  ;;  %3570 = vmatpush3.bf16.msra.mxu1 %v3891_v24  ;;  %v3235_v24 = vld [vmem:[%s4879_s2 + $0x1] ss:$0 sm:$0xff] }
  0x62   : > { %3563 = vmatprep.subr.bf16.mxu0 %v4076_v0  ;;  %3571 = vmatprep.subr.bf16.mxu1 %v4076_v0 }
  0x63   : > { %3565 = vmatprep.mubr.msk.bf16.mxu0 %vm4077_vm0, %v4076_v0  ;;  %3573 = vmatprep.mubr.msk.bf16.mxu1 %vm4077_vm0, %v4076_v0 }
  0x65   : > { %3564 = vmatpush3.bf16.msra.mxu0 %v3892_v25  ;;  %3572 = vmatpush3.bf16.msra.mxu1 %v3893_v26 }
  0x66   : > { %3577 = vmatprep.subr.bf16.mxu0 %v4076_v0  ;;  %3585 = vmatprep.subr.bf16.mxu1 %v4076_v0 }
  0x68   : > { %3566 = vmatmul.mubr.msk.bf16.vlgmr.msra.gmra.mxu0 %vm557_vm1, %v4246_v6  ;;  %3574 = vmatmul.mubr.msk.bf16.vlgmr.msra.gmra.mxu1 %vm557_vm1, %v4246_v6 }
  0x69   : > { %3578 = vmatpush3.bf16.msra.mxu0 %v3894_v27  ;;  %3586 = vmatpush3.bf16.msra.mxu1 %v3895_v28 }
  0x6a   : > { %3579 = vmatprep.subr.bf16.mxu0 %v4076_v0  ;;  %3587 = vmatprep.subr.bf16.mxu1 %v4076_v0 }
  0x6b   : > { %3581 = vmatprep.mubr.msk.bf16.mxu0 %vm4077_vm0, %v4076_v0  ;;  %3589 = vmatprep.mubr.msk.bf16.mxu1 %vm4077_vm0, %v4076_v0 }
  0x6d   : > { %3580 = vmatpush3.bf16.msra.mxu0 %v3896_v29  ;;  %3588 = vmatpush3.bf16.msra.mxu1 %v3897_v30 }
  0x6e   : > { %3593 = vmatprep.subr.bf16.mxu0 %v4076_v0  ;;  %3601 = vmatprep.subr.bf16.mxu1 %v4076_v0 }
  0x70   : > { %3582 = vmatmul.mubr.msk.bf16.vlgmr.msra.gmra.mxu0 %vm557_vm1, %v4246_v6  ;;  %3590 = vmatmul.mubr.msk.bf16.vlgmr.msra.gmra.mxu1 %vm557_vm1, %v4246_v6 }
  0x71   : > { %3594 = vmatpush3.bf16.msra.mxu0 %v3898_v31  ;;  %3602 = vmatpush3.bf16.msra.mxu1 %v3899_v32 }
  0x72   : > { %3595 = vmatprep.subr.bf16.mxu0 %v4076_v0  ;;  %3603 = vmatprep.subr.bf16.mxu1 %v4076_v0 }
  0x73   : > { %3597 = vmatprep.mubr.msk.bf16.mxu0 %vm4077_vm0, %v4076_v0  ;;  %3605 = vmatprep.mubr.msk.bf16.mxu1 %vm4077_vm0, %v4076_v0 }
  0x75   : > { %3596 = vmatpush3.bf16.msra.mxu0 %v3900_v33  ;;  %3604 = vmatpush3.bf16.msra.mxu1 %v3901_v34 }
  0x76   : > { %3609 = vmatprep.subr.bf16.mxu0 %v4076_v0  ;;  %3617 = vmatprep.subr.bf16.mxu1 %v4076_v0 }
  0x78   : > { %3598 = vmatmul.mubr.msk.bf16.vlgmr.msra.gmra.mxu0 %vm557_vm1, %v4246_v6  ;;  %3606 = vmatmul.mubr.msk.bf16.vlgmr.msra.gmra.mxu1 %vm557_vm1, %v4246_v6 }
  0x79   : > { %3613 = vmatprep.mubr.msk.bf16.mxu0 %vm4077_vm0, %v4076_v0  ;;  %3621 = vmatprep.mubr.msk.bf16.mxu1 %vm4077_vm0, %v4076_v0 }
  0x7a   : > { %3610 = vmatpush3.bf16.msra.mxu0 %v3902_v35  ;;  %3618 = vmatpush3.bf16.msra.mxu1 %v3904_v37 }
  0x7b   : > { %3611 = vmatprep.subr.bf16.mxu0 %v4076_v0  ;;  %3619 = vmatprep.subr.bf16.mxu1 %v4076_v0 }
  0x7e   : > { %3612 = vmatpush3.bf16.msra.mxu0 %v3903_v36  ;;  %3620 = vmatpush3.bf16.msra.mxu1 %v3905_v38 }
  0x7f   : > { %3625 = vmatprep.subr.bf16.mxu0 %v4076_v0  ;;  %3633 = vmatprep.subr.bf16.mxu1 %v4076_v0 }
  0x81   : > { %3614 = vmatmul.mubr.msk.bf16.vlgmr.msra.gmra.mxu0 %vm557_vm1, %v4246_v6  ;;  %3622 = vmatmul.mubr.msk.bf16.vlgmr.msra.gmra.mxu1 %vm557_vm1, %v4246_v6 }
  0x82   : > { %3626 = vmatpush3.bf16.msra.mxu0 %v3906_v39  ;;  %3629 = vmatprep.mubr.msk.bf16.mxu0 %vm4077_vm0, %v4076_v0  ;;  %v3244_v39 = vld [vmem:[%s4879_s2 + $0xa] ss:$0 sm:$0xff] }
  0x83   : > { %3627 = vmatprep.subr.bf16.mxu0 %v4076_v0  ;;  %3634 = vmatpush3.bf16.msra.mxu1 %v3908_v41 }
  0x84   : > { %3635 = vmatprep.subr.bf16.mxu1 %v4076_v0  ;;  %3637 = vmatprep.mubr.msk.bf16.mxu1 %vm4077_vm0, %v4076_v0 }
  0x86   : > { %3628 = vmatpush3.bf16.msra.mxu0 %v3907_v40 }
  0x87   : > { %3641 = vmatprep.subr.bf16.mxu0 %v4076_v0  ;;  %3636 = vmatpush3.bf16.msra.mxu1 %v3909_v42  ;;  %v3245_v42 = vld [vmem:[%s4879_s2 + $0xb] ss:$0 sm:$0xff] }
  0x88   : > { %3649 = vmatprep.subr.bf16.mxu1 %v4076_v0 }
  0x89   : > { %3630 = vmatmul.mubr.msk.bf16.vlgmr.msra.gmra.mxu0 %vm557_vm1, %v4246_v6 }
  0x8a   : > { %3642 = vmatpush3.bf16.msra.mxu0 %v3910_v43  ;;  %3645 = vmatprep.mubr.msk.bf16.mxu0 %vm4077_vm0, %v4076_v0 }
  0x8b   : > { %3643 = vmatprep.subr.bf16.mxu0 %v4076_v0  ;;  %3638 = vmatmul.mubr.msk.bf16.vlgmr.msra.gmra.mxu1 %vm557_vm1, %v4246_v6 }
  0x8c   : > { %3650 = vmatpush3.bf16.msra.mxu1 %v3912_v45  ;;  %3653 = vmatprep.mubr.msk.bf16.mxu1 %vm4077_vm0, %v4076_v0 }
  0x8d   : > { %3651 = vmatprep.subr.bf16.mxu1 %v4076_v0 }
  0x8e   : > { %3644 = vmatpush3.bf16.msra.mxu0 %v3911_v44  ;;  %v3236_v44 = vld [vmem:[%s4879_s2 + $0x2] ss:$0 sm:$0xff] }
  0x8f   : > { %3657 = vmatprep.subr.bf16.mxu0 %v4076_v0 }
  0x90   : > { %3652 = vmatpush3.bf16.msra.mxu1 %v3913_v46  ;;  %v3237_v46 = vld [vmem:[%s4879_s2 + $0x3] ss:$0 sm:$0xff] }
  0x91   : > { %3646 = vmatmul.mubr.msk.bf16.vlgmr.msra.gmra.mxu0 %vm557_vm1, %v4246_v6  ;;  %3665 = vmatprep.subr.bf16.mxu1 %v4076_v0 }
  0x92   : > { %3658 = vmatpush3.bf16.msra.mxu0 %v3914_v47  ;;  %3661 = vmatprep.mubr.msk.bf16.mxu0 %vm4077_vm0, %v4076_v0 }
  0x93   : > { %3659 = vmatprep.subr.bf16.mxu0 %v4076_v0  ;;  %3654 = vmatmul.mubr.msk.bf16.vlgmr.msra.gmra.mxu1 %vm557_vm1, %v4246_v6 }
  0x94   : > { %3666 = vmatpush3.bf16.msra.mxu1 %v3916_v49  ;;  %3669 = vmatprep.mubr.msk.bf16.mxu1 %vm4077_vm0, %v4076_v0 }
  0x95   : > { %3667 = vmatprep.subr.bf16.mxu1 %v4076_v0 }
  0x96   : > { %3660 = vmatpush3.bf16.msra.mxu0 %v3915_v48 }
  0x97   : > { %3673 = vmatprep.subr.bf16.mxu0 %v4076_v0 }
  0x98   : > { %3668 = vmatpush3.bf16.msra.mxu1 %v3917_v50 }
  0x99   : > { %3662 = vmatmul.mubr.msk.bf16.vlgmr.msra.gmra.mxu0 %vm557_vm1, %v4246_v6  ;;  %3679 = vmatprep.subr.bf16.mxu1 %v4076_v0 }
  0x9a   : > { %3675 = vmatprep.mubr.msk.bf16.mxu0 %vm4077_vm0, %v4076_v0 }
  0x9b   : > { %3670 = vmatmul.mubr.msk.bf16.vlgmr.msra.gmra.mxu1 %vm557_vm1, %v4246_v6 }
  0x9c   : > { %3681 = vmatprep.mubr.msk.bf16.mxu1 %vm4077_vm0, %v4076_v0 }
 0x100   : > { %v595_v51 = vpop.f32.mrf.mxu0  ;;  %v647_v52 = vpop.f32.mrf.mxu1 }
 0x101   : > { %v596_v29 = vadd.f32 %v3234_v22, %v595_v51  ;;  %v648_v32 = vadd.f32 %v3235_v24, %v647_v52 }
 0x102   : > { %v3487_v53 = vpop.f32.mrf.mxu0  ;;  %v3495_v54 = vpop.f32.mrf.mxu1 }
 0x103   : > { %v1797_v40 = vmul.f32 0.5, %v596_v29  ;;  %v1798_v43 = vmul.f32 0.5, %v648_v32 }
 0x104   : > { %v598_v55 = vpop.f32.mrf.mxu0  ;;  %v650_v56 = vpop.f32.mrf.mxu1 }
 0x105   : > { %v1805_v51 = vpack.c.bf16 %v1797_v40, %v1797_v40  ;;  %v1806_v55 = vpack.c.bf16 %v1798_v43, %v1798_v43 }
 0x106   : > { %v3488_v57 = vpop.f32.mrf.mxu0  ;;  %v3496_v58 = vpop.f32.mrf.mxu1 }
 0x108   : > { %v699_v59 = vpop.f32.mrf.mxu0  ;;  %v4522_v60 = vpop.f32.mrf.mxu1 }
 0x109   : > { %v700_v52 = vadd.f32 %v3236_v44, %v699_v59  ;;  %v752_v56 = vadd.f32 %v3237_v46, %v4522_v60  ;;  %v3246_v59 = vld [vmem:[%s4879_s2 + $0xc] ss:$0 sm:$0xff]  ;;  %v3247_v60 = vld [vmem:[%s4879_s2 + $0xd] ss:$0 sm:$0xff] }
 0x10a   : > { %v3503_v61 = vpop.f32.mrf.mxu0  ;;  %v3511_v62 = vpop.f32.mrf.mxu1 }
 0x10c   : > { %v702_v63 = vpop.f32.mrf.mxu0  ;;  %v754_v1 = vpop.f32.mrf.mxu1 }
 0x10e   : > { %v3504_v2 = vpop.f32.mrf.mxu0  ;;  %v3512_v3 = vpop.f32.mrf.mxu1 }
 0x10f   : > { %v1799_v2 = vmul.f32 0.5, %v700_v52 }
 0x110   : > { %v4524_v4 = vpop.f32.mrf.mxu0  ;;  %v4526_v5 = vpop.f32.mrf.mxu1 }
 0x112   : > { %v3519_v6 = vpop.f32.mrf.mxu0  ;;  %v3527_v7 = vpop.f32.mrf.mxu1 }
 0x113   : > { %v1800_v6 = vmul.f32 0.5, %v752_v56  ;;  %v3238_v7 = vld [vmem:[%s4879_s2 + $0x4] ss:$0 sm:$0xff] }
 0x114   : > { %v806_v8 = vpop.f32.mrf.mxu0  ;;  %v858_v9 = vpop.f32.mrf.mxu1 }
 0x115   : > { %v3239_v9 = vld [vmem:[%s4879_s2 + $0x5] ss:$0 sm:$0xff] }
 0x116   : > { %v3520_v10 = vpop.f32.mrf.mxu0  ;;  %v3528_v11 = vpop.f32.mrf.mxu1 }
 0x118   : > { %v4528_v12 = vpop.f32.mrf.mxu0  ;;  %v4530_v13 = vpop.f32.mrf.mxu1 }
 0x11a   : > { %v3535_v14 = vpop.f32.mrf.mxu0  ;;  %v3543_v15 = vpop.f32.mrf.mxu1 }
 0x11c   : > { %v910_v16 = vpop.f32.mrf.mxu0  ;;  %v962_v17 = vpop.f32.mrf.mxu1 }
 0x11d   : > { %v1807_v16 = vpack.c.bf16 %v1799_v2, %v1799_v2  ;;  %v804_v17 = vadd.f32 %v3238_v7, %v4524_v4  ;;  %v3248_v4 = vld [vmem:[%s4879_s2 + $0xe] ss:$0 sm:$0xff] }
 0x11e   : > { %v3536_v18 = vpop.f32.mrf.mxu0  ;;  %v3544_v20 = vpop.f32.mrf.mxu1 }
 0x11f   : > { %v1808_v20 = vpack.c.bf16 %v1800_v6, %v1800_v6 }
 0x120   : > { %v1011_v23 = vpop.f32.mrf.mxu0  ;;  %v1063_v26 = vpop.f32.mrf.mxu1 }
 0x121   : > { %v1012_v25 = vadd.f32 %v3242_v19, %v1011_v23  ;;  %v1064_v27 = vadd.f32 %v3243_v21, %v1063_v26  ;;  %v856_v21 = vadd.f32 %v3239_v9, %v4526_v5  ;;  %v3249_v5 = vld [vmem:[%s4879_s2 + $0xf] ss:$0 sm:$0xff] }
 0x122   : > { %v3551_v28 = vpop.f32.mrf.mxu0  ;;  %v3559_v31 = vpop.f32.mrf.mxu1 }
 0x123   : > { %v1813_v30 = vpack.c.bf16 %v1012_v25, %v1012_v25  ;;  %v1814_v33 = vpack.c.bf16 %v1064_v27, %v1064_v27  ;;  %v1801_v28 = vmul.f32 0.5, %v804_v17  ;;  %v3240_v31 = vld [vmem:[%s4879_s2 + $0x6] ss:$0 sm:$0xff] }
 0x124   : > { %v1014_v34 = vpop.f32.mrf.mxu0  ;;  %v1066_v36 = vpop.f32.mrf.mxu1 }
 0x125   : > { %v1834_v35 = vsel %vm1829_vm2, %v1813_v30, 0  ;;  %v1880_v37 = vsel %vm1829_vm2, %v1814_v33, 0  ;;  %v1802_v30 = vmul.f32 0.5, %v856_v21  ;;  %v3241_v33 = vld [vmem:[%s4879_s2 + $0x7] ss:$0 sm:$0xff] }
 0x126   : > { %v3552_v38 = vpop.f32.mrf.mxu0  ;;  %3674 = vmatpush3.bf16.xpose.msra.mxu0 %v1834_v35  ;;  %v3560_v41 = vpop.f32.mrf.mxu1  ;;  %3680 = vmatpush3.bf16.xpose.msra.mxu1 %v1880_v37  ;;  %v960_v43 = vadd.f32 %v3241_v33, %v4530_v13 }
 0x127   : > { %3685 = vmatprep.subr.bf16.mxu0 %v4076_v0  ;;  %3691 = vmatprep.subr.bf16.mxu1 %v4076_v0  ;;  %v1809_v38 = vpack.c.bf16 %v1801_v28, %v1801_v28 }
 0x128   : > { %v1115_v45 = vpop.f32.mrf.mxu0  ;;  %v1167_v48 = vpop.f32.mrf.mxu1  ;;  %v1804_v13 = vmul.f32 0.5, %v960_v43 }
 0x129   : > { %v1116_v47 = vadd.f32 %v3244_v39, %v1115_v45  ;;  %v1168_v49 = vadd.f32 %v3245_v42, %v1167_v48  ;;  %v908_v39 = vadd.f32 %v3240_v31, %v4528_v12  ;;  %v1810_v42 = vpack.c.bf16 %v1802_v30, %v1802_v30 }
 0x12a   : > { %v3567_v50 = vpop.f32.mrf.mxu0  ;;  %v3575_v54 = vpop.f32.mrf.mxu1  ;;  %v1812_v52 = vpack.c.bf16 %v1804_v13, %v1804_v13 }
 0x12b   : > { %v1815_v53 = vpack.c.bf16 %v1116_v47, %v1116_v47  ;;  %v1816_v57 = vpack.c.bf16 %v1168_v49, %v1168_v49  ;;  %v1803_v50 = vmul.f32 0.5, %v908_v39 }
 0x12c   : > { %v1118_v58 = vpop.f32.mrf.mxu0  ;;  %v1170_v62 = vpop.f32.mrf.mxu1 }
 0x12d   : > { %v1926_v61 = vsel %vm1829_vm2, %v1815_v53, 0  ;;  %3676 = vmatmul.mubr.msk.bf16.vlgmr.msra.gmra.mxu0 %vm1829_vm2, %v1805_v51  ;;  %v1972_v63 = vsel %vm1829_vm2, %v1816_v57, 0  ;;  %3682 = vmatmul.mubr.msk.bf16.vlgmr.msra.gmra.mxu1 %vm1829_vm2, %v1806_v55  ;;  %v1811_v51 = vpack.c.bf16 %v1803_v50, %v1803_v50  ;;  %v3250_v53 = vld [vmem:[%s4879_s2 + $0x10] ss:$0 sm:$0xff]  ;;  %v3251_v57 = vld [vmem:[%s4879_s2 + $0x11] ss:$0 sm:$0xff] }
 0x12e   : > { %v3568_v1 = vpop.f32.mrf.mxu0  ;;  %3686 = vmatpush3.bf16.xpose.msra.mxu0 %v1926_v61  ;;  %v3576_v3 = vpop.f32.mrf.mxu1  ;;  %3692 = vmatpush3.bf16.xpose.msra.mxu1 %v1972_v63 }
 0x12f   : > { %3687 = vmatprep.mubr.msk.bf16.mxu0 %vm4077_vm0, %v4076_v0  ;;  %3693 = vmatprep.mubr.msk.bf16.mxu1 %vm4077_vm0, %v4076_v0  ;;  %v3252_v3 = vld [vmem:[%s4879_s2 + $0x12] ss:$0 sm:$0xff] }
 0x130   : > { %v1219_v8 = vpop.f32.mrf.mxu0  ;;  %3697 = vmatprep.subr.bf16.mxu0 %v4076_v0  ;;  %v1271_v11 = vpop.f32.mrf.mxu1  ;;  %3703 = vmatprep.subr.bf16.mxu1 %v4076_v0 }
 0x131   : > { %v1220_v10 = vadd.f32 %v3246_v59, %v1219_v8  ;;  %v1272_v14 = vadd.f32 %v3247_v60, %v1271_v11 }
 0x132   : > { %v3583_v15 = vpop.f32.mrf.mxu0  ;;  %v3591_v19 = vpop.f32.mrf.mxu1 }
 0x133   : > { %v1817_v18 = vpack.c.bf16 %v1220_v10, %v1220_v10  ;;  %v1818_v22 = vpack.c.bf16 %v1272_v14, %v1272_v14  ;;  %v3253_v14 = vld [vmem:[%s4879_s2 + $0x13] ss:$0 sm:$0xff] }
 0x134   : > { %v1222_v23 = vpop.f32.mrf.mxu0  ;;  %v1274_v25 = vpop.f32.mrf.mxu1 }
 0x135   : > { %v2018_v24 = vsel %vm1829_vm2, %v1817_v18, 0  ;;  %3688 = vmatmul.mubr.msk.bf16.vlgmr.msra.gmra.mxu0 %vm1829_vm2, %v1807_v16  ;;  %v2064_v26 = vsel %vm1829_vm2, %v1818_v22, 0  ;;  %3694 = vmatmul.mubr.msk.bf16.vlgmr.msra.gmra.mxu1 %vm1829_vm2, %v1808_v20  ;;  %v3254_v22 = vld [vmem:[%s4879_s2 + $0x14] ss:$0 sm:$0xff] }
 0x136   : > { %v3584_v27 = vpop.f32.mrf.mxu0  ;;  %3698 = vmatpush3.bf16.xpose.msra.mxu0 %v2018_v24  ;;  %v3592_v29 = vpop.f32.mrf.mxu1  ;;  %3704 = vmatpush3.bf16.xpose.msra.mxu1 %v2064_v26 }
 0x137   : > { %3699 = vmatprep.mubr.msk.bf16.mxu0 %vm4077_vm0, %v4076_v0  ;;  %3705 = vmatprep.mubr.msk.bf16.mxu1 %vm4077_vm0, %v4076_v0  ;;  %v3255_v29 = vld [vmem:[%s4879_s2 + $0x15] ss:$0 sm:$0xff] }
 0x138   : > { %v1323_v32 = vpop.f32.mrf.mxu0  ;;  %3709 = vmatprep.subr.bf16.mxu0 %v4076_v0  ;;  %v1375_v35 = vpop.f32.mrf.mxu1  ;;  %3715 = vmatprep.subr.bf16.mxu1 %v4076_v0 }
 0x139   : > { %v1324_v34 = vadd.f32 %v3248_v4, %v1323_v32  ;;  %v1376_v36 = vadd.f32 %v3249_v5, %v1375_v35 }
 0x13a   : > { %v3599_v37 = vpop.f32.mrf.mxu0  ;;  %v3607_v41 = vpop.f32.mrf.mxu1 }
 0x13b   : > { %v1819_v40 = vpack.c.bf16 %v1324_v34, %v1324_v34  ;;  %v1820_v44 = vpack.c.bf16 %v1376_v36, %v1376_v36  ;;  %v3256_v36 = vld [vmem:[%s4879_s2 + $0x16] ss:$0 sm:$0xff] }
 0x13c   : > { %v1326_v45 = vpop.f32.mrf.mxu0  ;;  %v1378_v47 = vpop.f32.mrf.mxu1 }
 0x13d   : > { %v2110_v46 = vsel %vm1829_vm2, %v1819_v40, 0  ;;  %3700 = vmatmul.mubr.msk.bf16.vlgmr.msra.gmra.mxu0 %vm1829_vm2, %v1809_v38  ;;  %v2156_v48 = vsel %vm1829_vm2, %v1820_v44, 0  ;;  %3706 = vmatmul.mubr.msk.bf16.vlgmr.msra.gmra.mxu1 %vm1829_vm2, %v1810_v42  ;;  %v3257_v44 = vld [vmem:[%s4879_s2 + $0x17] ss:$0 sm:$0xff] }
 0x13e   : > { %v3600_v49 = vpop.f32.mrf.mxu0  ;;  %3710 = vmatpush3.bf16.xpose.msra.mxu0 %v2110_v46  ;;  %v3608_v12 = vpop.f32.mrf.mxu1  ;;  %3716 = vmatpush3.bf16.xpose.msra.mxu1 %v2156_v48 }
 0x13f   : > { %3711 = vmatprep.mubr.msk.bf16.mxu0 %vm4077_vm0, %v4076_v0  ;;  %3717 = vmatprep.mubr.msk.bf16.mxu1 %vm4077_vm0, %v4076_v0 }
 0x140   : > { %3721 = vmatprep.subr.bf16.mxu0 %v4076_v0  ;;  %3727 = vmatprep.subr.bf16.mxu1 %v4076_v0 }
 0x141   : > { %v1427_v54 = vpop.f32.mrf.mxu0  ;;  %v1479_v62 = vpop.f32.mrf.mxu1 }
 0x142   : > { %v1428_v55 = vadd.f32 %v3250_v53, %v1427_v54  ;;  %v1480_v1 = vadd.f32 %v3251_v57, %v1479_v62 }
 0x143   : > { %v3615_v56 = vpop.f32.mrf.mxu0  ;;  %v3623_v2 = vpop.f32.mrf.mxu1 }
 0x144   : > { %v1821_v58 = vpack.c.bf16 %v1428_v55, %v1428_v55  ;;  %v1822_v60 = vpack.c.bf16 %v1480_v1, %v1480_v1 }
 0x145   : > { %3712 = vmatmul.mubr.msk.bf16.vlgmr.msra.gmra.mxu0 %vm1829_vm2, %v1811_v51  ;;  %3718 = vmatmul.mubr.msk.bf16.vlgmr.msra.gmra.mxu1 %vm1829_vm2, %v1812_v52  ;;  %v1430_v61 = vpop.f32.mrf.mxu0  ;;  %v1482_v6 = vpop.f32.mrf.mxu1 }
 0x146   : > { %3723 = vmatprep.mubr.msk.bf16.mxu0 %vm4077_vm0, %v4076_v0  ;;  %3729 = vmatprep.mubr.msk.bf16.mxu1 %vm4077_vm0, %v4076_v0  ;;  %v2300_v63 = vsel %vm2298_vm3, %v1821_v58, 0  ;;  %v2346_v8 = vsel %vm2298_vm3, %v1822_v60, 0 }
 0x147   : > { %v3616_v59 = vpop.f32.mrf.mxu0  ;;  %3722 = vmatpush3.bf16.msra.mxu0 %v2300_v63  ;;  %v3624_v10 = vpop.f32.mrf.mxu1  ;;  %3728 = vmatpush3.bf16.msra.mxu1 %v2346_v8 }
 0x148   : > { %3733 = vmatprep.subr.bf16.mxu0 %v4076_v0  ;;  %3739 = vmatprep.subr.bf16.mxu1 %v4076_v0 }
 0x149   : > { %v1531_v7 = vpop.f32.mrf.mxu0 }
 0x14a   : > { %v1532_v9 = vadd.f32 %v3252_v3, %v1531_v7 }
 0x14b   : > { %v3631_v11 = vpop.f32.mrf.mxu0  ;;  %v1583_v17 = vpop.f32.mrf.mxu1 }
 0x14c   : > { %v1823_v15 = vpack.c.bf16 %v1532_v9, %v1532_v9  ;;  %v1584_v19 = vadd.f32 %v3253_v14, %v1583_v17 }
 0x14d   : > { %v1534_v16 = vpop.f32.mrf.mxu0  ;;  %v3639_v21 = vpop.f32.mrf.mxu1 }
 0x14e   : > { %v4642_v18 = vsel %vm2298_vm3, %v1823_v15, 0  ;;  %v1824_v23 = vpack.c.bf16 %v1584_v19, %v1584_v19 }
 0x14f   : > { %v3632_v20 = vpop.f32.mrf.mxu0  ;;  %v1586_v24 = vpop.f32.mrf.mxu1 }
 0x150   : > { %v4648_v26 = vsel %vm2298_vm3, %v1824_v23, 0 }
 0x151   : > { %v1635_v25 = vpop.f32.mrf.mxu0  ;;  %v3640_v4 = vpop.f32.mrf.mxu1 }
 0x152   : > { %v1636_v27 = vadd.f32 %v3254_v22, %v1635_v25 }
 0x153   : > { %v3647_v28 = vpop.f32.mrf.mxu0  ;;  %v1687_v31 = vpop.f32.mrf.mxu1 }
 0x154   : > { %v1825_v5 = vpack.c.bf16 %v1636_v27, %v1636_v27  ;;  %v1688_v33 = vadd.f32 %v3255_v29, %v1687_v31 }
 0x155   : > { %v1638_v30 = vpop.f32.mrf.mxu0  ;;  %v3655_v35 = vpop.f32.mrf.mxu1 }
 0x156   : > { %v4654_v32 = vsel %vm2298_vm3, %v1825_v5, 0  ;;  %v1826_v37 = vpack.c.bf16 %v1688_v33, %v1688_v33 }
 0x157   : > { %v3648_v34 = vpop.f32.mrf.mxu0  ;;  %v1690_v38 = vpop.f32.mrf.mxu1 }
 0x158   : > { %v4660_v40 = vsel %vm2298_vm3, %v1826_v37, 0 }
 0x159   : > { %v1739_v39 = vpop.f32.mrf.mxu0  ;;  %v3656_v42 = vpop.f32.mrf.mxu1 }
 0x15a   : > { %v1740_v41 = vadd.f32 %v3256_v36, %v1739_v39 }
 0x15b   : > { %v3663_v43 = vpop.f32.mrf.mxu0  ;;  %v1791_v47 = vpop.f32.mrf.mxu1 }
 0x15c   : > { %v1827_v45 = vpack.c.bf16 %v1740_v41, %v1740_v41  ;;  %v1792_v49 = vadd.f32 %v3257_v44, %v1791_v47 }
 0x15d   : > { %v1742_v46 = vpop.f32.mrf.mxu0  ;;  %v3671_v12 = vpop.f32.mrf.mxu1 }
 0x15e   : > { %v4666_v48 = vsel %vm2298_vm3, %v1827_v45, 0  ;;  %v1828_v13 = vpack.c.bf16 %v1792_v49, %v1792_v49 }
 0x15f   : > { %v3664_v50 = vpop.f32.mrf.mxu0  ;;  %v1794_v51 = vpop.f32.mrf.mxu1 }
 0x160   : > { %v4669_v52 = vsel %vm2298_vm3, %v1828_v13, 0 }
 0x161   : > { %v3672_v53 = vpop.f32.mrf.mxu1 }
 0x1ed   : > { %v1870_v54 = vpop.f32.mrf.mxu0  ;;  %v1916_v55 = vpop.f32.mrf.mxu1 }
 0x1ee   : > { %v2199_v56 = vsel %vm2198_vm4, %v1870_v54, -inf  ;;  %v2202_v63 = vsel %vm2198_vm4, %v1916_v55, -inf }
 0x1ef   : > { %2200 = vmax.xlane.f32.xlu0 %v2199_v56  ;;  %v3677_v57 = vpop.f32.mrf.mxu0  ;;  %v3683_v58 = vpop.f32.mrf.mxu1 }
 0x1f1   : > { %v1873_v61 = vpop.f32.mrf.mxu0  ;;  %v1919_v62 = vpop.f32.mrf.mxu1 }
 0x1f3   : > { %2203 = vmax.xlane.f32.xlu0 %v2202_v63  ;;  %v3678_v1 = vpop.f32.mrf.mxu0  ;;  %v3684_v59 = vpop.f32.mrf.mxu1 }
 0x1f5   : > { %v1962_v2 = vpop.f32.mrf.mxu0  ;;  %v2008_v3 = vpop.f32.mrf.mxu1 }
 0x1f6   : > { %v2205_v60 = vsel %vm2198_vm4, %v1962_v2, -inf  ;;  %v2208_v10 = vsel %vm2198_vm4, %v2008_v3, -inf }
 0x1f7   : > { %2206 = vmax.xlane.f32.xlu1 %v2205_v60  ;;  %v3689_v6 = vpop.f32.mrf.mxu0  ;;  %v3695_v7 = vpop.f32.mrf.mxu1 }
 0x1f9   : > { %v1965_v8 = vpop.f32.mrf.mxu0  ;;  %v2011_v9 = vpop.f32.mrf.mxu1 }
 0x1fb   : > { %2209 = vmax.xlane.f32.xlu1 %v2208_v10  ;;  %v3690_v11 = vpop.f32.mrf.mxu0  ;;  %v3696_v14 = vpop.f32.mrf.mxu1 }
 0x1fd   : > { %v2054_v15 = vpop.f32.mrf.mxu0  ;;  %v2100_v16 = vpop.f32.mrf.mxu1 }
 0x1fe   : > { %v2211_v17 = vsel %vm2198_vm4, %v2054_v15, -inf  ;;  %v2214_v19 = vsel %vm2198_vm4, %v2100_v16, -inf }
 0x1ff   : > { %2212 = vmax.xlane.f32.xlu0 %v2211_v17  ;;  %v3701_v20 = vpop.f32.mrf.mxu0  ;;  %v3707_v21 = vpop.f32.mrf.mxu1  ;;  %2215 = vmax.xlane.f32.xlu1 %v2214_v19 }
 0x201   : > { %v2057_v22 = vpop.f32.mrf.mxu0  ;;  %v2103_v23 = vpop.f32.mrf.mxu1 }
 0x203   : > { %v3702_v24 = vpop.f32.mrf.mxu0  ;;  %v3708_v25 = vpop.f32.mrf.mxu1 }
 0x205   : > { %v2146_v27 = vpop.f32.mrf.mxu0  ;;  %v2192_v4 = vpop.f32.mrf.mxu1 }
 0x206   : > { %v2217_v28 = vsel %vm2198_vm4, %v2146_v27, -inf  ;;  %v2220_v29 = vsel %vm2198_vm4, %v2192_v4, -inf }
 0x207   : > { %2218 = vmax.xlane.f32.xlu0 %v2217_v28  ;;  %v3713_v5 = vpop.f32.mrf.mxu0  ;;  %v3719_v30 = vpop.f32.mrf.mxu1  ;;  %2221 = vmax.xlane.f32.xlu1 %v2220_v29 }
 0x209   : > { %v2149_v31 = vpop.f32.mrf.mxu0  ;;  %v2195_v33 = vpop.f32.mrf.mxu1 }
 0x20b   : > { %v3714_v34 = vpop.f32.mrf.mxu0  ;;  %v3720_v35 = vpop.f32.mrf.mxu1 }
 0x278   : > { %v2201_v36 = vpop.xlane.xlu0 %2200 }
 0x279   : > { %v2223_v37 = vsub.f32 %v1870_v54, %v2201_v36 }
 0x27b   : > { %v2231_v38 = vmul.f32 1.442695, %v2223_v37 }
 0x27c   : > { %v2204_v39 = vpop.xlane.xlu0 %2203 }
 0x27d   : > { %3918 = vpow2.f32 %v2231_v38  ;;  %v2224_v41 = vsub.f32 %v1916_v55, %v2204_v39 }
 0x27f   : > { %v2233_v42 = vmul.f32 1.442695, %v2224_v41 }
 0x280   : > { %v2207_v43 = vpop.xlane.xlu1 %2206 }
 0x281   : > { %3920 = vpow2.f32 %v2233_v42  ;;  %v2225_v44 = vsub.f32 %v1962_v2, %v2207_v43 }
 0x283   : > { %v2235_v45 = vmul.f32 1.442695, %v2225_v44 }
 0x284   : > { %v2210_v46 = vpop.xlane.xlu1 %2209 }
 0x285   : > { %3922 = vpow2.f32 %v2235_v45  ;;  %v2226_v47 = vsub.f32 %v2008_v3, %v2210_v46 }
 0x287   : > { %v2237_v49 = vmul.f32 1.442695, %v2226_v47 }
 0x288   : > { %v2213_v50 = vpop.xlane.xlu0 %2212  ;;  %v2216_v12 = vpop.xlane.xlu1 %2215 }
 0x289   : > { %3924 = vpow2.f32 %v2237_v49  ;;  %v2227_v13 = vsub.f32 %v2054_v15, %v2213_v50  ;;  %v2228_v53 = vsub.f32 %v2100_v16, %v2216_v12 }
 0x28a   : > { %v3919_v51 = vpop.eup %3918 }
 0x28b   : > { %v2239_v54 = vmul.f32 1.442695, %v2227_v13  ;;  %v2247_v56 = vsel %vm2198_vm4, %v3919_v51, 0.0  ;;  %v2241_v57 = vmul.f32 1.442695, %v2228_v53 }
 0x28c   : > { %2248 = vadd.xlane.f32.xlu0 %v2247_v56 }
 0x28d   : > { %3926 = vpow2.f32 %v2239_v54 }
 0x28e   : > { %v3921_v55 = vpop.eup %3920  ;;  %3928 = vpow2.f32 %v2241_v57 }
 0x28f   : > { %v2250_v58 = vsel %vm2198_vm4, %v3921_v55, 0.0 }
 0x290   : > { %2251 = vadd.xlane.f32.xlu1 %v2250_v58  ;;  %v2219_v61 = vpop.xlane.xlu0 %2218  ;;  %v2222_v62 = vpop.xlane.xlu1 %2221 }
 0x291   : > { %v2229_v63 = vsub.f32 %v2146_v27, %v2219_v61  ;;  %v2230_v59 = vsub.f32 %v2192_v4, %v2222_v62 }
 0x292   : > { %v3923_v1 = vpop.eup %3922 }
 0x293   : > { %v2243_v2 = vmul.f32 1.442695, %v2229_v63  ;;  %v2253_v3 = vsel %vm2198_vm4, %v3923_v1, 0.0  ;;  %v2245_v60 = vmul.f32 1.442695, %v2230_v59 }
 0x294   : > { %2254 = vadd.xlane.f32.xlu0 %v2253_v3 }
 0x295   : > { %3930 = vpow2.f32 %v2243_v2  ;;  %v2673_v2 = vld [vmem:[%s4880_s3 + $0x2] sm:$0x3] }
 0x296   : > { %v3925_v6 = vpop.eup %3924  ;;  %3932 = vpow2.f32 %v2245_v60  ;;  %v2731_v3 = vsel %vm2683_vm5, %v2673_v2, 0  ;;  %v2674_v60 = vld [vmem:[%s4880_s3 + $0x4] sm:$0x3] }
 0x297   : > { %v2256_v7 = vsel %vm2198_vm4, %v3925_v6, 0.0 }
 0x298   : > { %2257 = vadd.xlane.f32.xlu1 %v2256_v7 }
 0x29a   : > { %v3927_v8 = vpop.eup %3926 }
 0x29b   : > { %v4683_v9 = vpop.eup %3928  ;;  %v2259_v10 = vsel %vm2198_vm4, %v3927_v8, 0.0 }
 0x29c   : > { %v2262_v11 = vsel %vm2198_vm4, %v4683_v9, 0.0  ;;  %2260 = vadd.xlane.f32.xlu0 %v2259_v10  ;;  %v2675_v10 = vld [vmem:[%s4880_s3 + $0x6] sm:$0x3] }
 0x29d   : > { %2263 = vadd.xlane.f32.xlu1 %v2262_v11 }
 0x2a2   : > { %v4688_v14 = vpop.eup %3930 }
 0x2a3   : > { %v4690_v15 = vpop.eup %3932  ;;  %v2265_v16 = vsel %vm2198_vm4, %v4688_v14, 0.0 }
 0x2a4   : > { %v2268_v17 = vsel %vm2198_vm4, %v4690_v15, 0.0  ;;  %2266 = vadd.xlane.f32.xlu0 %v2265_v16  ;;  %v2823_v16 = vsel %vm2683_vm5, %v2675_v10, 0 }
 0x2a5   : > { %2269 = vadd.xlane.f32.xlu1 %v2268_v17 }
 0x315   : > { %v2249_v19 = vpop.xlane.xlu0 %2248 }
 0x316   : > { %3934 = vrcp.f32 %v2249_v19 }
 0x319   : > { %v2252_v20 = vpop.xlane.xlu1 %2251 }
 0x31a   : > { %3936 = vrcp.f32 %v2252_v20  ;;  %v2676_v20 = vld [vmem:[%s4880_s3 + $0x8] sm:$0x3] }
 0x31d   : > { %v2255_v21 = vpop.xlane.xlu0 %2254 }
 0x31e   : > { %3938 = vrcp.f32 %v2255_v21 }
 0x321   : > { %v2258_v22 = vpop.xlane.xlu1 %2257 }
 0x322   : > { %3940 = vrcp.f32 %v2258_v22 }
 0x323   : > { %v3935_v23 = vpop.eup %3934 }
 0x324   : > { %v2272_v24 = vmul.f32 %v3935_v23, %v3919_v51  ;;  %v2672_v51 = vld [vmem:[%s4880_s3] sm:$0x3] }
 0x325   : > { %v2261_v25 = vpop.xlane.xlu0 %2260  ;;  %v2685_v61 = vsel %vm2683_vm5, %v2672_v51, 0 }
 0x326   : > { %v2264_v27 = vpop.xlane.xlu1 %2263  ;;  %3942 = vrcp.f32 %v2261_v25  ;;  %v2287_v4 = vpack.c.bf16 %v2272_v24, %v2272_v24 }
 0x327   : > { %v3937_v28 = vpop.eup %3936  ;;  %3944 = vrcp.f32 %v2264_v27 }
 0x328   : > { %3724 = vmatmul.mubr.msk.bf16.vlgmr.msra.gmra.mxu0 %vm2198_vm4, %v2287_v4  ;;  %v2274_v29 = vmul.f32 %v3937_v28, %v3921_v55  ;;  %v2677_v4 = vld [vmem:[%s4880_s3 + $0xa] sm:$0x3] }
 0x329   : > { %3734 = vmatpush3.bf16.msra.mxu0 %v4642_v18  ;;  %3735 = vmatprep.mubr.msk.bf16.mxu0 %vm4077_vm0, %v4076_v0 }
 0x32a   : > { %v2288_v5 = vpack.c.bf16 %v2274_v29, %v2274_v29  ;;  %3745 = vmatprep.subr.bf16.mxu0 %v4076_v0  ;;  %v3075_v36 = vsel %vm2198_vm4, %v2274_v29, 0.0 }
 0x32b   : > { %v3939_v30 = vpop.eup %3938 }
 0x32c   : > { %3730 = vmatmul.mubr.msk.bf16.vlgmr.msra.gmra.mxu1 %vm2198_vm4, %v2288_v5  ;;  %v2276_v31 = vmul.f32 %v3939_v30, %v3923_v1  ;;  %v2915_v30 = vsel %vm2683_vm5, %v2677_v4, 0 }
 0x32d   : > { %3740 = vmatpush3.bf16.msra.mxu1 %v4648_v26  ;;  %v2267_v33 = vpop.xlane.xlu0 %2266  ;;  %3741 = vmatprep.mubr.msk.bf16.mxu1 %vm4077_vm0, %v4076_v0  ;;  %v3074_v26 = vsel %vm2198_vm4, %v2272_v24, 0.0  ;;  %v2869_v24 = vsel %vm2683_vm5, %v2676_v20, 0 }
 0x32e   : > { %v2270_v34 = vpop.xlane.xlu1 %2269  ;;  %3946 = vrcp.f32 %v2267_v33  ;;  %v2289_v35 = vpack.c.bf16 %v2276_v31, %v2276_v31  ;;  %3751 = vmatprep.subr.bf16.mxu1 %v4076_v0  ;;  %v3077_v38 = vsel %vm2198_vm4, %v2276_v31, 0.0  ;;  %v3076_v42 = vadd.f32 %v3075_v36, %v3074_v26 }
 0x32f   : > { %v3941_v18 = vpop.eup %3940  ;;  %3948 = vrcp.f32 %v2270_v34  ;;  %v2678_v34 = vld [vmem:[%s4880_s3 + $0xc] sm:$0x3] }
 0x330   : > { %3736 = vmatmul.mubr.msk.bf16.vlgmr.msra.gmra.mxu0 %vm2198_vm4, %v2289_v35  ;;  %v2278_v37 = vmul.f32 %v3941_v18, %v3925_v6  ;;  %v3078_v46 = vadd.f32 %v3077_v38, %v3076_v42 }
 0x331   : > { %3746 = vmatpush3.bf16.msra.mxu0 %v4654_v32  ;;  %3747 = vmatprep.mubr.msk.bf16.mxu0 %vm4077_vm0, %v4076_v0 }
 0x332   : > { %v2290_v39 = vpack.c.bf16 %v2278_v37, %v2278_v37  ;;  %3757 = vmatprep.subr.bf16.mxu0 %v4076_v0  ;;  %v3079_v44 = vsel %vm2198_vm4, %v2278_v37, 0.0  ;;  %v2961_v37 = vsel %vm2683_vm5, %v2678_v34, 0 }
 0x333   : > { %v3943_v41 = vpop.eup %3942  ;;  %v3080_v50 = vadd.f32 %v3079_v44, %v3078_v46 }
 0x334   : > { %v3945_v43 = vpop.eup %3944  ;;  %3742 = vmatmul.mubr.msk.bf16.vlgmr.msra.gmra.mxu1 %vm2198_vm4, %v2290_v39  ;;  %v2280_v45 = vmul.f32 %v3943_v41, %v3927_v8  ;;  %v2777_v8 = vsel %vm2683_vm5, %v2674_v60, 0  ;;  %v2679_v39 = vld [vmem:[%s4880_s3 + $0xe] sm:$0x3] }
 0x335   : > { %3752 = vmatpush3.bf16.msra.mxu1 %v4660_v40  ;;  %3753 = vmatprep.mubr.msk.bf16.mxu1 %vm4077_vm0, %v4076_v0  ;;  %v2282_v49 = vmul.f32 %v3945_v43, %v4683_v9  ;;  %v3007_v44 = vsel %vm2683_vm5, %v2679_v39, 0 }
 0x336   : > { %v2291_v32 = vpack.c.bf16 %v2280_v45, %v2280_v45  ;;  %v3081_v47 = vsel %vm2198_vm4, %v2280_v45, 0.0  ;;  %3763 = vmatprep.subr.bf16.mxu1 %v4076_v0 }
 0x337   : > { %v3082_v12 = vadd.f32 %v3081_v47, %v3080_v50  ;;  %v2292_v40 = vpack.c.bf16 %v2282_v49, %v2282_v49  ;;  %v3083_v56 = vsel %vm2198_vm4, %v2282_v49, 0.0 }
 0x338   : > { %3748 = vmatmul.mubr.msk.bf16.vlgmr.msra.gmra.mxu0 %vm2198_vm4, %v2291_v32 }
 0x339   : > { %3758 = vmatpush3.bf16.msra.mxu0 %v4666_v48  ;;  %3759 = vmatprep.mubr.msk.bf16.mxu0 %vm4077_vm0, %v4076_v0  ;;  %v3084_v57 = vadd.f32 %v3083_v56, %v3082_v12 }
 0x33a   : > { %3769 = vmatprep.subr.bf16.mxu0 %v4076_v0 }
 0x33b   : > { %v3947_v13 = vpop.eup %3946 }
 0x33c   : > { %v3949_v53 = vpop.eup %3948  ;;  %v2284_v54 = vmul.f32 %v3947_v13, %v4688_v14  ;;  %3754 = vmatmul.mubr.msk.bf16.vlgmr.msra.gmra.mxu1 %vm2198_vm4, %v2292_v40 }
 0x33d   : > { %v2286_v48 = vmul.f32 %v3949_v53, %v4690_v15  ;;  %3764 = vmatpush3.bf16.msra.mxu1 %v4669_v52  ;;  %3765 = vmatprep.mubr.msk.bf16.mxu1 %vm4077_vm0, %v4076_v0 }
 0x33e   : > { %v3085_v55 = vsel %vm2198_vm4, %v2284_v54, 0.0  ;;  %v2293_v58 = vpack.c.bf16 %v2284_v54, %v2284_v54  ;;  %3775 = vmatprep.subr.bf16.mxu1 %v4076_v0 }
 0x33f   : > { %v3086_v62 = vadd.f32 %v3085_v55, %v3084_v57  ;;  %v3087_v63 = vsel %vm2198_vm4, %v2286_v48, 0.0  ;;  %v2294_v1 = vpack.c.bf16 %v2286_v48, %v2286_v48 }
 0x340   : > { %3760 = vmatmul.mubr.msk.bf16.vlgmr.msra.gmra.mxu0 %vm2198_vm4, %v2293_v58 }
 0x341   : > { %3770 = vmatpush3.bf16.msra.mxu0 %v2685_v61  ;;  %3771 = vmatprep.mubr.msk.bf16.mxu0 %vm4077_vm0, %v4076_v0  ;;  %v3088_v52 = vadd.f32 %v3087_v63, %v3086_v62 }
 0x342   : > { %3781 = vmatprep.subr.bf16.mxu0 %v4076_v0 }
 0x343   : > { %v3089_v59 = vmul.f32 0.125, %v3088_v52 }
 0x344   : > { %3766 = vmatmul.mubr.msk.bf16.vlgmr.msra.gmra.mxu1 %vm2198_vm4, %v2294_v1 }
 0x345   : > { %3777 = vmatprep.mubr.msk.bf16.mxu1 %vm4077_vm0, %v4076_v0  ;;  %3090 = vst.msk [vmem:[%s277_s20] sm:$0xff] %vm2198_vm4, %v3089_v59  ;;  %3776 = vmatpush3.bf16.msra.mxu1 %v2731_v3 }
 0x346   : > { %3787 = vmatprep.subr.bf16.mxu1 %v4076_v0 }
 0x3e8   : > { %v2336_v6 = vpop.f32.mrf.mxu0 }
 0x3e9   : > { %v2664_v7 = vpack.c.bf16 %v2336_v6, %v2336_v6 }
 0x3ea   : > { %v3725_v9 = vpop.f32.mrf.mxu0 }
 0x3eb   : > { %3772 = vmatmul.mubr.msk.bf16.vlgmr.msra.gmra.mxu0 %vm1829_vm2, %v2664_v7 }
 0x3ec   : > { %v2339_v11 = vpop.f32.mrf.mxu0  ;;  %v2382_v14 = vpop.f32.mrf.mxu1  ;;  %3782 = vmatpush3.bf16.msra.mxu0 %v2777_v8  ;;  %3783 = vmatprep.mubr.msk.bf16.mxu0 %vm4077_vm0, %v4076_v0 }
 0x3ed   : > { %v2665_v15 = vpack.c.bf16 %v2382_v14, %v2382_v14  ;;  %3793 = vmatprep.subr.bf16.mxu0 %v4076_v0 }
 0x3ee   : > { %v3726_v17 = vpop.f32.mrf.mxu0  ;;  %v3731_v19 = vpop.f32.mrf.mxu1 }
 0x3ef   : > { %3778 = vmatmul.mubr.msk.bf16.vlgmr.msra.gmra.mxu1 %vm1829_vm2, %v2665_v15 }
 0x3f0   : > { %v2385_v21 = vpop.f32.mrf.mxu1  ;;  %v2428_v22 = vpop.f32.mrf.mxu0  ;;  %3788 = vmatpush3.bf16.msra.mxu1 %v2823_v16  ;;  %3789 = vmatprep.mubr.msk.bf16.mxu1 %vm4077_vm0, %v4076_v0 }
 0x3f1   : > { %v2666_v23 = vpack.c.bf16 %v2428_v22, %v2428_v22  ;;  %3799 = vmatprep.subr.bf16.mxu1 %v4076_v0 }
 0x3f2   : > { %v3732_v25 = vpop.f32.mrf.mxu1  ;;  %v3737_v27 = vpop.f32.mrf.mxu0 }
 0x3f3   : > { %3784 = vmatmul.mubr.msk.bf16.vlgmr.msra.gmra.mxu0 %vm1829_vm2, %v2666_v23 }
 0x3f4   : > { %v2431_v28 = vpop.f32.mrf.mxu0  ;;  %v2474_v29 = vpop.f32.mrf.mxu1  ;;  %3794 = vmatpush3.bf16.msra.mxu0 %v2869_v24  ;;  %3795 = vmatprep.mubr.msk.bf16.mxu0 %vm4077_vm0, %v4076_v0 }
 0x3f5   : > { %v2667_v5 = vpack.c.bf16 %v2474_v29, %v2474_v29  ;;  %3805 = vmatprep.subr.bf16.mxu0 %v4076_v0 }
 0x3f6   : > { %v3738_v31 = vpop.f32.mrf.mxu0  ;;  %v3743_v33 = vpop.f32.mrf.mxu1 }
 0x3f7   : > { %3790 = vmatmul.mubr.msk.bf16.vlgmr.msra.gmra.mxu1 %vm1829_vm2, %v2667_v5 }
 0x3f8   : > { %v2477_v35 = vpop.f32.mrf.mxu1  ;;  %v2520_v18 = vpop.f32.mrf.mxu0  ;;  %3800 = vmatpush3.bf16.msra.mxu1 %v2915_v30  ;;  %3801 = vmatprep.mubr.msk.bf16.mxu1 %vm4077_vm0, %v4076_v0 }
 0x3f9   : > { %v2668_v36 = vpack.c.bf16 %v2520_v18, %v2520_v18  ;;  %3811 = vmatprep.subr.bf16.mxu1 %v4076_v0 }
 0x3fa   : > { %v3744_v26 = vpop.f32.mrf.mxu1  ;;  %v3749_v38 = vpop.f32.mrf.mxu0 }
 0x3fb   : > { %3796 = vmatmul.mubr.msk.bf16.vlgmr.msra.gmra.mxu0 %vm1829_vm2, %v2668_v36 }
 0x3fc   : > { %v2523_v41 = vpop.f32.mrf.mxu0  ;;  %v2566_v42 = vpop.f32.mrf.mxu1  ;;  %3806 = vmatpush3.bf16.msra.mxu0 %v2961_v37  ;;  %3807 = vmatprep.mubr.msk.bf16.mxu0 %vm4077_vm0, %v4076_v0 }
 0x3fd   : > { %v2669_v43 = vpack.c.bf16 %v2566_v42, %v2566_v42 }
 0x3fe   : > { %v3750_v45 = vpop.f32.mrf.mxu0  ;;  %v3755_v46 = vpop.f32.mrf.mxu1 }
 0x3ff   : > { %3802 = vmatmul.mubr.msk.bf16.vlgmr.msra.gmra.mxu1 %vm1829_vm2, %v2669_v43 }
 0x400   : > { %v2569_v32 = vpop.f32.mrf.mxu1  ;;  %v2612_v47 = vpop.f32.mrf.mxu0  ;;  %3812 = vmatpush3.bf16.msra.mxu1 %v3007_v44  ;;  %3813 = vmatprep.mubr.msk.bf16.mxu1 %vm4077_vm0, %v4076_v0 }
 0x401   : > { %v2670_v49 = vpack.c.bf16 %v2612_v47, %v2612_v47 }
 0x402   : > { %v3756_v50 = vpop.f32.mrf.mxu1  ;;  %v3761_v12 = vpop.f32.mrf.mxu0 }
 0x403   : > { %3808 = vmatmul.mubr.msk.bf16.vlgmr.msra.gmra.mxu0 %vm1829_vm2, %v2670_v49 }
 0x404   : > { %v2615_v40 = vpop.f32.mrf.mxu0  ;;  %v2658_v13 = vpop.f32.mrf.mxu1 }
 0x405   : > { %v2671_v51 = vpack.c.bf16 %v2658_v13, %v2658_v13 }
 0x406   : > { %v3762_v53 = vpop.f32.mrf.mxu0  ;;  %v3767_v54 = vpop.f32.mrf.mxu1 }
 0x407   : > { %3814 = vmatmul.mubr.msk.bf16.vlgmr.msra.gmra.mxu1 %vm1829_vm2, %v2671_v51 }
 0x408   : > { %v2661_v56 = vpop.f32.mrf.mxu1 }
 0x40a   : > { %v3768_v48 = vpop.f32.mrf.mxu1 }
 0x40b   : > { %3992 = shalt.err (!%p3989_p10)
}
 0x40c   : > { %s3993_s12 = scalar_lea.hbm %s3121_s15, 128  ;;  %s3997_s14 = scalar_lea.hbm %s4883_s6, 256 }
 0x40d   : > { %p3994_p2 = scmp.ne.s32.totalorder %s3121_s15, %s3993_s12  ;;  %p3998_p7 = scmp.lt.s32.totalorder %s3121_s15, %s4883_s6 }
 0x40e   : > { %p3999_p0 = scmp.lt.s32.totalorder %s3997_s14, %s3993_s12 }
 0x40f   : > { %p3995_p4 = pnand %p3994_p2, %p4896_p12 }
 0x410   : > { %p4000_p6 = por %p3999_p0, %p3998_p7 }
 0x411   : > { %p3996_p9 = pneg %p3995_p4 }
 0x413   : > { %p4001_p11 = pnand %p4000_p6, %p3996_p9 }
 0x415   : > { %4004 = shalt.err (!%p4001_p11)
}
 0x416   : > { %3820 = dma.vmem_to_hbm [thread:$0]  (%p4896_p12), %s3124_s17, 128, %s3121_s15, %s3097_s29   ;;  %v3354_v37 = vld [vmem:[%s4881_s4] ss:$0 sm:$0xff] }
 0x417   : > { %s270_s15 = scalar_lea.vmem [#allocation5], %s4216_s28  ;;  %s4897_s29 = scalar_lea.vmem [#allocation2], %s4216_s28 }
 0x418   : > { %s3110_s17 = sshll.u32 %s270_s15, 4  ;;  %v3950_v43 = vld [vmem:[%s4897_s29] sm:$0xff]  ;;  %s4898_s16 = sshll.u32 %s4136_s25, 7  ;;  %s3111_s17 = int_to_ptr.vmem [resolvable:$true] %s3110_s17 }
 0x419   : > { %s3108_s7 = scalar_lea.hbm %s4882_s5, %s4898_s16  ;;  %s3092_s12 = scalar_lea.sflag [#allocation4], %s4213_s26 }
 0x41a   : > { %s4005_s20 = scalar_lea.vmem %s3111_s17, 128  ;;  %s4079_s11 = smov [#allocation5]  }
 0x41b   : > { %p4006_p13 = scmp.ne.s32.totalorder %s3111_s17, %s4005_s20  ;;  %s4009_s14 = sshll.u32 %s4079_s11, 4  ;;  %s4010_s14 = int_to_ptr.vmem [resolvable:$false] %s4009_s14 }
 0x41c   : > { %s4011_s28 = scalar_lea.vmem %s4010_s14, 256  ;;  %p4012_p5 = scmp.lt.s32.totalorder %s3111_s17, %s4010_s14 }
 0x41d   : > { %p4007_p1 = pnand %p4006_p13, %p4896_p12  ;;  %p4013_p8 = scmp.lt.s32.totalorder %s4011_s28, %s4005_s20 }
 0x41f   : > { %p4008_p3 = pneg %p4007_p1  ;;  %p4014_p10 = por %p4013_p8, %p4012_p5 }
 0x421   : > { %p4015_p2 = pnand %p4014_p10, %p4008_p3 }
 0x4ab   : > { %v2721_v0 = vpop.f32.mrf.mxu0 }
 0x4ac   : > { %v3049_v10 = vsel %vm557_vm1, %v2721_v0, 0.0 }
 0x4ad   : > { %v3773_v57 = vpop.f32.mrf.mxu0 }
 0x4af   : > { %v2724_v55 = vpop.f32.mrf.mxu0  ;;  %v2767_v58 = vpop.f32.mrf.mxu1 }
 0x4b0   : > { %v3050_v7 = vsel %vm557_vm1, %v2767_v58, 0.0 }
 0x4b1   : > { %v3774_v61 = vpop.f32.mrf.mxu0  ;;  %v3779_v62 = vpop.f32.mrf.mxu1  ;;  %v3051_v14 = vadd.f32 %v3050_v7, %v3049_v10 }
 0x4b3   : > { %v2770_v63 = vpop.f32.mrf.mxu1  ;;  %v2813_v52 = vpop.f32.mrf.mxu0 }
 0x4b4   : > { %v3052_v11 = vsel %vm557_vm1, %v2813_v52, 0.0 }
 0x4b5   : > { %v3780_v1 = vpop.f32.mrf.mxu1  ;;  %v3785_v59 = vpop.f32.mrf.mxu0  ;;  %v3053_v19 = vadd.f32 %v3052_v11, %v3051_v14 }
 0x4b7   : > { %v2816_v2 = vpop.f32.mrf.mxu0  ;;  %v2859_v3 = vpop.f32.mrf.mxu1 }
 0x4b8   : > { %v3054_v17 = vsel %vm557_vm1, %v2859_v3, 0.0 }
 0x4b9   : > { %v3786_v60 = vpop.f32.mrf.mxu0  ;;  %v3791_v6 = vpop.f32.mrf.mxu1  ;;  %v3055_v23 = vadd.f32 %v3054_v17, %v3053_v19 }
 0x4bb   : > { %v2862_v8 = vpop.f32.mrf.mxu1  ;;  %v2905_v9 = vpop.f32.mrf.mxu0 }
 0x4bc   : > { %v3056_v22 = vsel %vm557_vm1, %v2905_v9, 0.0 }
 0x4bd   : > { %v3792_v15 = vpop.f32.mrf.mxu1  ;;  %v3797_v16 = vpop.f32.mrf.mxu0  ;;  %v3057_v4 = vadd.f32 %v3056_v22, %v3055_v23 }
 0x4bf   : > { %v2908_v20 = vpop.f32.mrf.mxu0  ;;  %v2951_v21 = vpop.f32.mrf.mxu1 }
 0x4c0   : > { %v3058_v27 = vsel %vm557_vm1, %v2951_v21, 0.0 }
 0x4c1   : > { %v3798_v24 = vpop.f32.mrf.mxu0  ;;  %v3803_v25 = vpop.f32.mrf.mxu1  ;;  %v3059_v30 = vadd.f32 %v3058_v27, %v3057_v4 }
 0x4c3   : > { %v2954_v28 = vpop.f32.mrf.mxu1  ;;  %v2997_v29 = vpop.f32.mrf.mxu0 }
 0x4c4   : > { %v3060_v5 = vsel %vm557_vm1, %v2997_v29, 0.0 }
 0x4c5   : > { %v3804_v31 = vpop.f32.mrf.mxu1  ;;  %v3809_v33 = vpop.f32.mrf.mxu0  ;;  %v3061_v34 = vadd.f32 %v3060_v5, %v3059_v30 }
 0x4c7   : > { %v3000_v35 = vpop.f32.mrf.mxu0  ;;  %v3043_v18 = vpop.f32.mrf.mxu1 }
 0x4c8   : > { %v3062_v36 = vsel %vm557_vm1, %v3043_v18, 0.0 }
 0x4c9   : > { %v3063_v26 = vadd.f32 %v3062_v36, %v3061_v34  ;;  %v3810_v38 = vpop.f32.mrf.mxu0  ;;  %v3815_v39 = vpop.f32.mrf.mxu1 }
 0x4cb   : > { %v3071_v41 = vadd.f32 %v3354_v37, %v3063_v26  ;;  %v3046_v42 = vpop.f32.mrf.mxu1 }
 0x4cd   : > { %v3072_v44 = vadd.f32 %v3950_v43, %v3071_v41  ;;  %v3816_v45 = vpop.f32.mrf.mxu1 }
 0x4cf   : > { %3073 = vst.msk [vmem:[%s270_s15] sm:$0xff] %vm557_vm1, %v3072_v44 }
 0x4d0   : > { %4018 = shalt.err (!%p4015_p2)
}
 0x4d1   : > { %s4019_s25 = scalar_lea.hbm %s3108_s7, 128  ;;  %s4023_s13 = scalar_lea.hbm %s4882_s5, 256 }
 0x4d2   : > { %p4020_p4 = scmp.ne.s32.totalorder %s3108_s7, %s4019_s25  ;;  %p4024_p0 = scmp.lt.s32.totalorder %s3108_s7, %s4882_s5 }
 0x4d3   : > { %p4025_p6 = scmp.lt.s32.totalorder %s4023_s13, %s4019_s25 }
 0x4d4   : > { %p4021_p9 = pnand %p4020_p4, %p4896_p12 }
 0x4d5   : > { %p4026_p11 = por %p4025_p6, %p4024_p0 }
 0x4d6   : > { %p4022_p7 = pneg %p4021_p9 }
 0x4d8   : > { %p4027_p13 = pnand %p4026_p11, %p4022_p7 }
 0x4da   : > { %4030 = shalt.err (!%p4027_p13)
}
 0x4db   : > { %3819 = dma.vmem_to_hbm [thread:$0]  (%p4896_p12), %s3111_s17, 128, %s3108_s7, %s3092_s12  }
 0x4dc PF: > { %s3135_s16 = sand.u32 1, %s4061_s21   ;;  %p4899_p1 = scmp.ne.s32.totalorder %s4891_s10, 0 }
 0x4dd   : > { %p4900_p3 = scmp.ge.s32.totalorder %s4073_s24, 2  ;;  %s3136_s18 = scalar_lea.sflag [#allocation4], %s3135_s16 }
 0x4df   : > { %p3828_p5 = pnand %p4900_p3, %p4899_p1 }
 0x4e1   : > { %p3829_p8 = pneg %p3828_p5 }
 0x4e3   : > { %4052 = dma.done.wait (%p3829_p8), %s3136_s18, 128  }
 0x4e4   : > { %4054 = vsyncadd (%p3829_p8), %s3136_s18, 4294967168  ;;  %s3145_s8 = scalar_lea.sflag [#allocation7], %s3135_s16 }
 0x4e5   : > { %4056 = dma.done.wait (%p3829_p8), %s3145_s8, 128  }
 0x4e6   : > { %4058 = vsyncadd (%p3829_p8), %s3145_s8, 4294967168  ;;  %p23_p12 = scmp.ge.s32.totalorder %s4140_s27, 4   ;;  %s4901_s21 = smov %s4065_s22 }
 0x4e7   : > { %s4902_s22 = smov %s4069_s23  ;;  %s4903_s23 = smov %s4152_s30 }
 0x4e8   : > { %s4904_s24 = smov %s4140_s27  ;;  %25 = sbr.rel (!%p23_p12) target bundleno = 7 (0x7), region = 102 }
 0x4ed   :  { %3150 = vsyncpa [#allocation3], 1 }
 0x4ee   :  { %3152 = vsyncpa [#allocation3 + $0x1], 1 }
 0x4ef   :  { %3153 = vsyncpa [#allocation4], 1 }
 0x4f0   :  { %3155 = vsyncpa [#allocation4 + $0x1], 1 }
 0x4f1   :  { %3156 = vsyncpa [#allocation7], 1 }
 0x4f2   :  { %3158 = vsyncpa [#allocation7 + $0x1], 1 }

</bundles_post_ra>
